<compile_context>
chip_gen: v6e
topology: v6e:2x2x1
jax: 0.10.0
libtpu: 0.0.40
codegen_flags: <defaults>
</compile_context>

<pallas_src>
import jax
import jax.numpy as jnp
from jax import lax
from jax.experimental import pallas as pl
from jax.experimental.pallas import tpu as pltpu


def _round_up(v, m):
    return (v + m - 1) // m * m


# ----------------------------------------------------------------------------
# Fused DRDB kernel
# ----------------------------------------------------------------------------
def _make_drdb_kernel(n_dense, C0r, GRr, Lal, offs):
    n_tap = len(offs)

    def kernel(*refs):
        x_ref, mask_ref = refs[0], refs[1]
        dense_refs = refs[2:2 + 2 * n_dense]          # (w, b) per dense layer
        wf_ref = refs[2 + 2 * n_dense]
        bf_ref = refs[3 + 2 * n_dense]
        out_ref = refs[4 + 2 * n_dense]
        s_ref = refs[5 + 2 * n_dense]                 # VMEM feature stack
        tap_ref = refs[6 + 2 * n_dense]               # VMEM tap block

        mask = mask_ref[...]                          # (GRr, Lal), hoisted

        # Group 0 (input): wrapper already padded channels to C0r rows and
        # lanes to Lal (zeros), so this is one aligned full-tile store and no
        # other scratch initialization is needed.
        s_ref[0:C0r, :] = x_ref[0]

        c_r = C0r
        for layer in range(n_dense):
            w_ref = dense_refs[2 * layer]             # (GRr, n_tap * c_r)
            b_ref = dense_refs[2 * layer + 1]         # (GRr, 1)

            feat = s_ref[0:c_r, :]                    # aligned full-row read
            # Materialize the 9 dilated-conv taps as lane rolls of the whole
            # current stack (XLU shifts; wraparound only ever lands on ring /
            # dead-lane positions, which `mask` zeroes).
            for t, o in enumerate(offs):
                tap_ref[t * c_r:(t + 1) * c_r, :] = pltpu.roll(
                    feat, (-o) % Lal, axis=1)

            # One fused MXU contraction per layer.
            acc = jnp.dot(w_ref[...], tap_ref[0:n_tap * c_r, :],
                          preferred_element_type=jnp.float32)
            # bias + ReLU, then zero the padding ring / dead lanes so the next
            # layer sees proper zero padding; padded output rows are exact 0.
            acc = jnp.maximum(acc + b_ref[...], 0.0) * mask
            s_ref[c_r:c_r + GRr, :] = acc             # concat == aligned store
            c_r += GRr

        # 1x1 conv over the whole stack + bias + residual (rows [0:C0r] still
        # hold x in the same layout -> free residual add).
        y = jnp.dot(wf_ref[...], s_ref[0:c_r, :],
                    preferred_element_type=jnp.float32)
        out_ref[0] = (y + bf_ref[...] + s_ref[0:C0r, :]).astype(out_ref.dtype)

    return kernel


# ----------------------------------------------------------------------------
# Wrapper: layout glue + pallas_call
# ----------------------------------------------------------------------------
def drdb_forward(params, x_nchw):
    """Fused DRDB forward. x_nchw: (B, C0, H, W) -> (B, C0, H, W)."""
    B, C0, H, W = x_nchw.shape
    GR = params["dense"][0][0].shape[-1]
    nD = len(params["dense"])
    Hp, Wp = H + 4, W + 4
    Lpad = Hp * Wp                       # padded-flat spatial length
    Lal = _round_up(Lpad, 128)           # lane-dense: 400 -> 512
    C0r = _round_up(C0, 8)               # sublane-aligned row groups
    GRr = _round_up(GR, 8)
    C_fin = C0 + nD * GR
    C_fin_r = C0r + nD * GRr

    def stack_row(ch):
        if ch < C0:
            return ch
        g, r = divmod(ch - C0, GR)
        return C0r + g * GRr + r

    # Flat lane offsets of the 9 dilated (d=2) taps relative to the centre.
    offs = [(ky - 1) * 2 * Wp + (kx - 1) * 2
            for ky in range(3) for kx in range(3)]

    # --- one-time layout glue on the input -----------------------------------
    x_p = jnp.pad(x_nchw, ((0, 0), (0, 0), (2, 2), (2, 2)))     # (B,C0,Hp,Wp)
    x_flat = jnp.pad(x_p.reshape(B, C0, Lpad),
                     ((0, 0), (0, C0r - C0), (0, Lal - Lpad)))  # (B,C0r,Lal)

    # Interior mask (1 inside HxW, 0 on the padding ring / dead lanes); also
    # neutralizes the roll wraparound, which only lands on non-interior lanes.
    idx = jnp.arange(Lal)
    py, px = idx // Wp, idx % Wp
    interior = (idx < Lpad) & (py >= 2) & (py < 2 + H) & (px >= 2) & (px < 2 + W)
    mask = jnp.broadcast_to(interior.astype(jnp.float32)[None, :], (GRr, Lal))

    kernel_inputs = [x_flat, mask]
    in_specs = [
        pl.BlockSpec((1, C0r, Lal), lambda b: (b, 0, 0)),
        pl.BlockSpec((GRr, Lal), lambda b: (0, 0)),
    ]

    # --- repack dense weights: HWIO (3,3,c,GR) -> (GRr, 9*c_r), tap-major ---
    c = C0
    for l, (w, bv) in enumerate(params["dense"]):
        c_r = C0r + l * GRr
        rows = jnp.array([stack_row(ch) for ch in range(c)])
        w_t = jnp.transpose(w, (3, 0, 1, 2)).reshape(GR, 9, c)   # (GR,9,c)
        wk = jnp.zeros((GRr, 9, c_r), jnp.float32).at[:GR, :, rows].set(w_t)
        wk = wk.reshape(GRr, 9 * c_r)
        bk = jnp.zeros((GRr, 1), jnp.float32).at[:GR, 0].set(bv)
        kernel_inputs += [wk, bk]
        in_specs += [
            pl.BlockSpec((GRr, 9 * c_r), lambda b: (0, 0)),
            pl.BlockSpec((GRr, 1), lambda b: (0, 0)),
        ]
        c += GR

    # --- repack 1x1 conv -----------------------------------------------------
    w1, b1 = params["conv1x1"]                       # (C_fin, C0), (C0,)
    rows_fin = jnp.array([stack_row(ch) for ch in range(C_fin)])
    w1k = jnp.zeros((C0r, C_fin_r), jnp.float32).at[:C0, rows_fin].set(w1.T)
    b1k = jnp.zeros((C0r, 1), jnp.float32).at[:C0, 0].set(b1)
    kernel_inputs += [w1k, b1k]
    in_specs += [
        pl.BlockSpec((C0r, C_fin_r), lambda b: (0, 0)),
        pl.BlockSpec((C0r, 1), lambda b: (0, 0)),
    ]

    tap_rows = 9 * (C0r + (nD - 1) * GRr) if nD > 0 else 8
    kernel = _make_drdb_kernel(nD, C0r, GRr, Lal, offs)

    out_flat = pl.pallas_call(
        kernel,
        out_shape=jax.ShapeDtypeStruct((B, C0r, Lal), x_nchw.dtype),
        grid=(B,),
        in_specs=in_specs,
        out_specs=pl.BlockSpec((1, C0r, Lal), lambda b: (b, 0, 0)),
        scratch_shapes=[
            pltpu.VMEM((C_fin_r, Lal), jnp.float32),      # feature stack
            pltpu.VMEM((tap_rows, Lal), jnp.float32),     # tap block
        ],
        compiler_params=pltpu.CompilerParams(
            dimension_semantics=("parallel",),
            vmem_limit_bytes=32 * 1024 * 1024),
    )(*kernel_inputs)

    # --- un-pad: drop padded channels / dead lanes / 2-wide ring -------------
    out = out_flat[:, :C0, :Lpad].reshape(B, C0, Hp, Wp)[:, :, 2:2 + H, 2:2 + W]
    return out


# ----------------------------------------------------------------------------
# Parameter init (deterministic, PyTorch-Conv2d-style uniform bounds)
# ----------------------------------------------------------------------------
def init_drdb_params(key, n_channels, n_denselayer, growth_rate):
    params = {"dense": []}
    c = n_channels
    for _ in range(n_denselayer):
        key, k1, k2 = jax.random.split(key, 3)
        bound = 1.0 / (c * 3 * 3) ** 0.5
        w = jax.random.uniform(k1, (3, 3, c, growth_rate), jnp.float32,
                               -bound, bound)
        b = jax.random.uniform(k2, (growth_rate,), jnp.float32, -bound, bound)
        params["dense"].append((w, b))
        c += growth_rate
    key, k1, k2 = jax.random.split(key, 3)
    bound = 1.0 / c ** 0.5
    params["conv1x1"] = (
        jax.random.uniform(k1, (c, n_channels), jnp.float32, -bound, bound),
        jax.random.uniform(k2, (n_channels,), jnp.float32, -bound, bound),
    )
    return params


# ----------------------------------------------------------------------------
# Pure-JAX reference (NCHW in / NCHW out) used as the correctness check
# ----------------------------------------------------------------------------
def drdb_reference(params, x_nchw):
    x = jnp.transpose(x_nchw, (0, 2, 3, 1))          # NHWC
    out = x
    for (w, b) in params["dense"]:
        y = jax.lax.conv_general_dilated(
            out, w, window_strides=(1, 1), padding=((2, 2), (2, 2)),
            rhs_dilation=(2, 2), dimension_numbers=("NHWC", "HWIO", "NHWC"),
            precision=lax.Precision.HIGHEST)
        y = jax.nn.relu(y + b)
        out = jnp.concatenate([out, y], axis=-1)
    w1, b1 = params["conv1x1"]
    y = jnp.einsum("bhwc,cd->bhwd", out, w1,
                   precision=lax.Precision.HIGHEST) + b1
    y = y + x
    return jnp.transpose(y, (0, 3, 1, 2))            # back to NCHW


if __name__ == "__main__":
    n_channels, n_denselayer, growth_rate = 4, 3, 4
    B, H, W = 2, 16, 16

    key = jax.random.PRNGKey(0)
    key, kx = jax.random.split(key)
    params = init_drdb_params(key, n_channels, n_denselayer, growth_rate)

    # PyTorch-style NCHW input.
    x_nchw = jax.random.normal(kx, (B, n_channels, H, W), jnp.float32)

    fwd = jax.jit(drdb_forward)
    out = jax.block_until_ready(fwd(params, x_nchw))

    ref = drdb_reference(params, x_nchw)
    assert out.shape == (B, n_channels, H, W)
    assert jnp.allclose(out, ref, atol=2e-3, rtol=2e-3), float(
        jnp.max(jnp.abs(out - ref)))

    print("KERNEL_OK")
</pallas_src>

<mosaic_0001>
module attributes {stable_mosaic.version = 11 : i64} {
  func.func @kernel(%arg0: i32, %arg1: memref<1x8x512xf32, #tpu.memory_space<vmem>>, %arg2: memref<8x512xf32, #tpu.memory_space<vmem>>, %arg3: memref<8x72xf32, #tpu.memory_space<vmem>>, %arg4: memref<8x1xf32, #tpu.memory_space<vmem>>, %arg5: memref<8x144xf32, #tpu.memory_space<vmem>>, %arg6: memref<8x1xf32, #tpu.memory_space<vmem>>, %arg7: memref<8x216xf32, #tpu.memory_space<vmem>>, %arg8: memref<8x1xf32, #tpu.memory_space<vmem>>, %arg9: memref<8x32xf32, #tpu.memory_space<vmem>>, %arg10: memref<8x1xf32, #tpu.memory_space<vmem>>, %arg11: memref<1x8x512xf32, #tpu.memory_space<vmem>>, %arg12: memref<32x512xf32, #tpu.memory_space<vmem>>, %arg13: memref<216x512xf32, #tpu.memory_space<vmem>>) attributes {dimension_semantics = [#tpu.dimension_semantics<parallel>], iteration_bounds = array<i64: 2>, scalar_prefetch = 0 : i64, scratch_operands = 2 : i64, tpu.core_type = #tpu.core_type<tc>, window_params = [{transform_indices = @transform_0, window_bounds = array<i64: 1, 8, 512>}, {pipeline_mode = #tpu.pipeline_mode<synchronous>, transform_indices = @transform_1, window_bounds = array<i64: 8, 512>}, {pipeline_mode = #tpu.pipeline_mode<synchronous>, transform_indices = @transform_2, window_bounds = array<i64: 8, 72>}, {pipeline_mode = #tpu.pipeline_mode<synchronous>, transform_indices = @transform_3, window_bounds = array<i64: 8, 1>}, {pipeline_mode = #tpu.pipeline_mode<synchronous>, transform_indices = @transform_4, window_bounds = array<i64: 8, 144>}, {pipeline_mode = #tpu.pipeline_mode<synchronous>, transform_indices = @transform_5, window_bounds = array<i64: 8, 1>}, {pipeline_mode = #tpu.pipeline_mode<synchronous>, transform_indices = @transform_6, window_bounds = array<i64: 8, 216>}, {pipeline_mode = #tpu.pipeline_mode<synchronous>, transform_indices = @transform_7, window_bounds = array<i64: 8, 1>}, {pipeline_mode = #tpu.pipeline_mode<synchronous>, transform_indices = @transform_8, window_bounds = array<i64: 8, 32>}, {pipeline_mode = #tpu.pipeline_mode<synchronous>, transform_indices = @transform_9, window_bounds = array<i64: 8, 1>}, {transform_indices = @transform_10, window_bounds = array<i64: 1, 8, 512>}]} {
    %c0 = arith.constant 0 : index
    %c0_0 = arith.constant 0 : index
    %0 = vector.load %arg2[%c0, %c0_0] : memref<8x512xf32, #tpu.memory_space<vmem>>, vector<8x512xf32>
    %c0_1 = arith.constant 0 : index
    %c0_2 = arith.constant 0 : index
    %c0_3 = arith.constant 0 : index
    %1 = vector.load %arg1[%c0_1, %c0_2, %c0_3] : memref<1x8x512xf32, #tpu.memory_space<vmem>>, vector<1x8x512xf32>
    %2 = vector.shape_cast %1 : vector<1x8x512xf32> to vector<8x512xf32>
    %c0_4 = arith.constant 0 : index
    %c0_5 = arith.constant 0 : index
    %3 = vector.load %arg12[%c0_4, %c0_5] : memref<32x512xf32, #tpu.memory_space<vmem>>, vector<8x512xf32>
    tpu.vector_store %arg12[%c0_4, %c0_5], %2 {strides = array<i32>} : memref<32x512xf32, #tpu.memory_space<vmem>>, vector<8x512xf32>,
    %c0_6 = arith.constant 0 : index
    %c0_7 = arith.constant 0 : index
    %4 = vector.load %arg12[%c0_6, %c0_7] : memref<32x512xf32, #tpu.memory_space<vmem>>, vector<8x512xf32>
    %c42_i32 = arith.constant 42 : i32
    %5 = tpu.dynamic_rotate %4 by %c42_i32 dim 1 : vector<8x512xf32>, i32 -> vector<8x512xf32>
    %c0_8 = arith.constant 0 : index
    %c0_9 = arith.constant 0 : index
    %6 = vector.load %arg13[%c0_8, %c0_9] : memref<216x512xf32, #tpu.memory_space<vmem>>, vector<8x512xf32>
    tpu.vector_store %arg13[%c0_8, %c0_9], %5 {strides = array<i32>} : memref<216x512xf32, #tpu.memory_space<vmem>>, vector<8x512xf32>,
    %c40_i32 = arith.constant 40 : i32
    %7 = tpu.dynamic_rotate %4 by %c40_i32 dim 1 : vector<8x512xf32>, i32 -> vector<8x512xf32>
    %c8 = arith.constant 8 : index
    %c0_10 = arith.constant 0 : index
    %8 = vector.load %arg13[%c8, %c0_10] : memref<216x512xf32, #tpu.memory_space<vmem>>, vector<8x512xf32>
    tpu.vector_store %arg13[%c8, %c0_10], %7 {strides = array<i32>} : memref<216x512xf32, #tpu.memory_space<vmem>>, vector<8x512xf32>,
    %c38_i32 = arith.constant 38 : i32
    %9 = tpu.dynamic_rotate %4 by %c38_i32 dim 1 : vector<8x512xf32>, i32 -> vector<8x512xf32>
    %c16 = arith.constant 16 : index
    %c0_11 = arith.constant 0 : index
    %10 = vector.load %arg13[%c16, %c0_11] : memref<216x512xf32, #tpu.memory_space<vmem>>, vector<8x512xf32>
    tpu.vector_store %arg13[%c16, %c0_11], %9 {strides = array<i32>} : memref<216x512xf32, #tpu.memory_space<vmem>>, vector<8x512xf32>,
    %c2_i32 = arith.constant 2 : i32
    %11 = tpu.dynamic_rotate %4 by %c2_i32 dim 1 : vector<8x512xf32>, i32 -> vector<8x512xf32>
    %c24 = arith.constant 24 : index
    %c0_12 = arith.constant 0 : index
    %12 = vector.load %arg13[%c24, %c0_12] : memref<216x512xf32, #tpu.memory_space<vmem>>, vector<8x512xf32>
    tpu.vector_store %arg13[%c24, %c0_12], %11 {strides = array<i32>} : memref<216x512xf32, #tpu.memory_space<vmem>>, vector<8x512xf32>,
    %c0_i32 = arith.constant 0 : i32
    %13 = tpu.dynamic_rotate %4 by %c0_i32 dim 1 : vector<8x512xf32>, i32 -> vector<8x512xf32>
    %c32 = arith.constant 32 : index
    %c0_13 = arith.constant 0 : index
    %14 = vector.load %arg13[%c32, %c0_13] : memref<216x512xf32, #tpu.memory_space<vmem>>, vector<8x512xf32>
    tpu.vector_store %arg13[%c32, %c0_13], %13 {strides = array<i32>} : memref<216x512xf32, #tpu.memory_space<vmem>>, vector<8x512xf32>,
    %c510_i32 = arith.constant 510 : i32
    %15 = tpu.dynamic_rotate %4 by %c510_i32 dim 1 : vector<8x512xf32>, i32 -> vector<8x512xf32>
    %c40 = arith.constant 40 : index
    %c0_14 = arith.constant 0 : index
    %16 = vector.load %arg13[%c40, %c0_14] : memref<216x512xf32, #tpu.memory_space<vmem>>, vector<8x512xf32>
    tpu.vector_store %arg13[%c40, %c0_14], %15 {strides = array<i32>} : memref<216x512xf32, #tpu.memory_space<vmem>>, vector<8x512xf32>,
    %c474_i32 = arith.constant 474 : i32
    %17 = tpu.dynamic_rotate %4 by %c474_i32 dim 1 : vector<8x512xf32>, i32 -> vector<8x512xf32>
    %c48 = arith.constant 48 : index
    %c0_15 = arith.constant 0 : index
    %18 = vector.load %arg13[%c48, %c0_15] : memref<216x512xf32, #tpu.memory_space<vmem>>, vector<8x512xf32>
    tpu.vector_store %arg13[%c48, %c0_15], %17 {strides = array<i32>} : memref<216x512xf32, #tpu.memory_space<vmem>>, vector<8x512xf32>,
    %c472_i32 = arith.constant 472 : i32
    %19 = tpu.dynamic_rotate %4 by %c472_i32 dim 1 : vector<8x512xf32>, i32 -> vector<8x512xf32>
    %c56 = arith.constant 56 : index
    %c0_16 = arith.constant 0 : index
    %20 = vector.load %arg13[%c56, %c0_16] : memref<216x512xf32, #tpu.memory_space<vmem>>, vector<8x512xf32>
    tpu.vector_store %arg13[%c56, %c0_16], %19 {strides = array<i32>} : memref<216x512xf32, #tpu.memory_space<vmem>>, vector<8x512xf32>,
    %c470_i32 = arith.constant 470 : i32
    %21 = tpu.dynamic_rotate %4 by %c470_i32 dim 1 : vector<8x512xf32>, i32 -> vector<8x512xf32>
    %c64 = arith.constant 64 : index
    %c0_17 = arith.constant 0 : index
    %22 = vector.load %arg13[%c64, %c0_17] : memref<216x512xf32, #tpu.memory_space<vmem>>, vector<8x512xf32>
    tpu.vector_store %arg13[%c64, %c0_17], %21 {strides = array<i32>} : memref<216x512xf32, #tpu.memory_space<vmem>>, vector<8x512xf32>,
    %c0_18 = arith.constant 0 : index
    %c0_19 = arith.constant 0 : index
    %23 = vector.load %arg3[%c0_18, %c0_19] : memref<8x72xf32, #tpu.memory_space<vmem>>, vector<8x72xf32>
    %c0_20 = arith.constant 0 : index
    %c0_21 = arith.constant 0 : index
    %24 = vector.load %arg13[%c0_20, %c0_21] : memref<216x512xf32, #tpu.memory_space<vmem>>, vector<72x512xf32>
    %cst = arith.constant dense<0.000000e+00> : vector<8x512xf32>
    %25 = tpu.matmul %23, %24, %cst {dimension_numbers = #tpu.dot_dimension_numbers<[1], [0], [0], [1], [0, 0, 1, 1], [], []>} : vector<8x72xf32>, vector<72x512xf32>, vector<8x512xf32> -> vector<8x512xf32>
    %c0_22 = arith.constant 0 : index
    %c0_23 = arith.constant 0 : index
    %26 = vector.load %arg4[%c0_22, %c0_23] : memref<8x1xf32, #tpu.memory_space<vmem>>, vector<8x1xf32>
    %27 = vector.broadcast %26 : vector<8x1xf32> to vector<8x512xf32>
    %28 = arith.addf %25, %27 : vector<8x512xf32>
    %cst_24 = arith.constant 0.000000e+00 : f32
    %29 = vector.broadcast %cst_24 : f32 to vector<8x512xf32>
    %30 = arith.maximumf %28, %29 : vector<8x512xf32>
    %31 = arith.mulf %30, %0 : vector<8x512xf32>
    %c8_25 = arith.constant 8 : index
    %c0_26 = arith.constant 0 : index
    %32 = vector.load %arg12[%c8_25, %c0_26] : memref<32x512xf32, #tpu.memory_space<vmem>>, vector<8x512xf32>
    tpu.vector_store %arg12[%c8_25, %c0_26], %31 {strides = array<i32>} : memref<32x512xf32, #tpu.memory_space<vmem>>, vector<8x512xf32>,
    %c0_27 = arith.constant 0 : index
    %c0_28 = arith.constant 0 : index
    %33 = vector.load %arg12[%c0_27, %c0_28] : memref<32x512xf32, #tpu.memory_space<vmem>>, vector<16x512xf32>
    %c42_i32_29 = arith.constant 42 : i32
    %34 = tpu.dynamic_rotate %33 by %c42_i32_29 dim 1 : vector<16x512xf32>, i32 -> vector<16x512xf32>
    %c0_30 = arith.constant 0 : index
    %c0_31 = arith.constant 0 : index
    %35 = vector.load %arg13[%c0_30, %c0_31] : memref<216x512xf32, #tpu.memory_space<vmem>>, vector<16x512xf32>
    tpu.vector_store %arg13[%c0_30, %c0_31], %34 {strides = array<i32>} : memref<216x512xf32, #tpu.memory_space<vmem>>, vector<16x512xf32>,
    %c40_i32_32 = arith.constant 40 : i32
    %36 = tpu.dynamic_rotate %33 by %c40_i32_32 dim 1 : vector<16x512xf32>, i32 -> vector<16x512xf32>
    %c16_33 = arith.constant 16 : index
    %c0_34 = arith.constant 0 : index
    %37 = vector.load %arg13[%c16_33, %c0_34] : memref<216x512xf32, #tpu.memory_space<vmem>>, vector<16x512xf32>
    tpu.vector_store %arg13[%c16_33, %c0_34], %36 {strides = array<i32>} : memref<216x512xf32, #tpu.memory_space<vmem>>, vector<16x512xf32>,
    %c38_i32_35 = arith.constant 38 : i32
    %38 = tpu.dynamic_rotate %33 by %c38_i32_35 dim 1 : vector<16x512xf32>, i32 -> vector<16x512xf32>
    %c32_36 = arith.constant 32 : index
    %c0_37 = arith.constant 0 : index
    %39 = vector.load %arg13[%c32_36, %c0_37] : memref<216x512xf32, #tpu.memory_space<vmem>>, vector<16x512xf32>
    tpu.vector_store %arg13[%c32_36, %c0_37], %38 {strides = array<i32>} : memref<216x512xf32, #tpu.memory_space<vmem>>, vector<16x512xf32>,
    %c2_i32_38 = arith.constant 2 : i32
    %40 = tpu.dynamic_rotate %33 by %c2_i32_38 dim 1 : vector<16x512xf32>, i32 -> vector<16x512xf32>
    %c48_39 = arith.constant 48 : index
    %c0_40 = arith.constant 0 : index
    %41 = vector.load %arg13[%c48_39, %c0_40] : memref<216x512xf32, #tpu.memory_space<vmem>>, vector<16x512xf32>
    tpu.vector_store %arg13[%c48_39, %c0_40], %40 {strides = array<i32>} : memref<216x512xf32, #tpu.memory_space<vmem>>, vector<16x512xf32>,
    %c0_i32_41 = arith.constant 0 : i32
    %42 = tpu.dynamic_rotate %33 by %c0_i32_41 dim 1 : vector<16x512xf32>, i32 -> vector<16x512xf32>
    %c64_42 = arith.constant 64 : index
    %c0_43 = arith.constant 0 : index
    %43 = vector.load %arg13[%c64_42, %c0_43] : memref<216x512xf32, #tpu.memory_space<vmem>>, vector<16x512xf32>
    tpu.vector_store %arg13[%c64_42, %c0_43], %42 {strides = array<i32>} : memref<216x512xf32, #tpu.memory_space<vmem>>, vector<16x512xf32>,
    %c510_i32_44 = arith.constant 510 : i32
    %44 = tpu.dynamic_rotate %33 by %c510_i32_44 dim 1 : vector<16x512xf32>, i32 -> vector<16x512xf32>
    %c80 = arith.constant 80 : index
    %c0_45 = arith.constant 0 : index
    %45 = vector.load %arg13[%c80, %c0_45] : memref<216x512xf32, #tpu.memory_space<vmem>>, vector<16x512xf32>
    tpu.vector_store %arg13[%c80, %c0_45], %44 {strides = array<i32>} : memref<216x512xf32, #tpu.memory_space<vmem>>, vector<16x512xf32>,
    %c474_i32_46 = arith.constant 474 : i32
    %46 = tpu.dynamic_rotate %33 by %c474_i32_46 dim 1 : vector<16x512xf32>, i32 -> vector<16x512xf32>
    %c96 = arith.constant 96 : index
    %c0_47 = arith.constant 0 : index
    %47 = vector.load %arg13[%c96, %c0_47] : memref<216x512xf32, #tpu.memory_space<vmem>>, vector<16x512xf32>
    tpu.vector_store %arg13[%c96, %c0_47], %46 {strides = array<i32>} : memref<216x512xf32, #tpu.memory_space<vmem>>, vector<16x512xf32>,
    %c472_i32_48 = arith.constant 472 : i32
    %48 = tpu.dynamic_rotate %33 by %c472_i32_48 dim 1 : vector<16x512xf32>, i32 -> vector<16x512xf32>
    %c112 = arith.constant 112 : index
    %c0_49 = arith.constant 0 : index
    %49 = vector.load %arg13[%c112, %c0_49] : memref<216x512xf32, #tpu.memory_space<vmem>>, vector<16x512xf32>
    tpu.vector_store %arg13[%c112, %c0_49], %48 {strides = array<i32>} : memref<216x512xf32, #tpu.memory_space<vmem>>, vector<16x512xf32>,
    %c470_i32_50 = arith.constant 470 : i32
    %50 = tpu.dynamic_rotate %33 by %c470_i32_50 dim 1 : vector<16x512xf32>, i32 -> vector<16x512xf32>
    %c128 = arith.constant 128 : index
    %c0_51 = arith.constant 0 : index
    %51 = vector.load %arg13[%c128, %c0_51] : memref<216x512xf32, #tpu.memory_space<vmem>>, vector<16x512xf32>
    tpu.vector_store %arg13[%c128, %c0_51], %50 {strides = array<i32>} : memref<216x512xf32, #tpu.memory_space<vmem>>, vector<16x512xf32>,
    %c0_52 = arith.constant 0 : index
    %c0_53 = arith.constant 0 : index
    %52 = vector.load %arg5[%c0_52, %c0_53] : memref<8x144xf32, #tpu.memory_space<vmem>>, vector<8x144xf32>
    %c0_54 = arith.constant 0 : index
    %c0_55 = arith.constant 0 : index
    %53 = vector.load %arg13[%c0_54, %c0_55] : memref<216x512xf32, #tpu.memory_space<vmem>>, vector<144x512xf32>
    %cst_56 = arith.constant dense<0.000000e+00> : vector<8x512xf32>
    %54 = tpu.matmul %52, %53, %cst_56 {dimension_numbers = #tpu.dot_dimension_numbers<[1], [0], [0], [1], [0, 0, 1, 1], [], []>} : vector<8x144xf32>, vector<144x512xf32>, vector<8x512xf32> -> vector<8x512xf32>
    %c0_57 = arith.constant 0 : index
    %c0_58 = arith.constant 0 : index
    %55 = vector.load %arg6[%c0_57, %c0_58] : memref<8x1xf32, #tpu.memory_space<vmem>>, vector<8x1xf32>
    %56 = vector.broadcast %55 : vector<8x1xf32> to vector<8x512xf32>
    %57 = arith.addf %54, %56 : vector<8x512xf32>
    %cst_59 = arith.constant 0.000000e+00 : f32
    %58 = vector.broadcast %cst_59 : f32 to vector<8x512xf32>
    %59 = arith.maximumf %57, %58 : vector<8x512xf32>
    %60 = arith.mulf %59, %0 : vector<8x512xf32>
    %c16_60 = arith.constant 16 : index
    %c0_61 = arith.constant 0 : index
    %61 = vector.load %arg12[%c16_60, %c0_61] : memref<32x512xf32, #tpu.memory_space<vmem>>, vector<8x512xf32>
    tpu.vector_store %arg12[%c16_60, %c0_61], %60 {strides = array<i32>} : memref<32x512xf32, #tpu.memory_space<vmem>>, vector<8x512xf32>,
    %c0_62 = arith.constant 0 : index
    %c0_63 = arith.constant 0 : index
    %62 = vector.load %arg12[%c0_62, %c0_63] : memref<32x512xf32, #tpu.memory_space<vmem>>, vector<24x512xf32>
    %c42_i32_64 = arith.constant 42 : i32
    %63 = tpu.dynamic_rotate %62 by %c42_i32_64 dim 1 : vector<24x512xf32>, i32 -> vector<24x512xf32>
    %c0_65 = arith.constant 0 : index
    %c0_66 = arith.constant 0 : index
    %64 = vector.load %arg13[%c0_65, %c0_66] : memref<216x512xf32, #tpu.memory_space<vmem>>, vector<24x512xf32>
    tpu.vector_store %arg13[%c0_65, %c0_66], %63 {strides = array<i32>} : memref<216x512xf32, #tpu.memory_space<vmem>>, vector<24x512xf32>,
    %c40_i32_67 = arith.constant 40 : i32
    %65 = tpu.dynamic_rotate %62 by %c40_i32_67 dim 1 : vector<24x512xf32>, i32 -> vector<24x512xf32>
    %c24_68 = arith.constant 24 : index
    %c0_69 = arith.constant 0 : index
    %66 = vector.load %arg13[%c24_68, %c0_69] : memref<216x512xf32, #tpu.memory_space<vmem>>, vector<24x512xf32>
    tpu.vector_store %arg13[%c24_68, %c0_69], %65 {strides = array<i32>} : memref<216x512xf32, #tpu.memory_space<vmem>>, vector<24x512xf32>,
    %c38_i32_70 = arith.constant 38 : i32
    %67 = tpu.dynamic_rotate %62 by %c38_i32_70 dim 1 : vector<24x512xf32>, i32 -> vector<24x512xf32>
    %c48_71 = arith.constant 48 : index
    %c0_72 = arith.constant 0 : index
    %68 = vector.load %arg13[%c48_71, %c0_72] : memref<216x512xf32, #tpu.memory_space<vmem>>, vector<24x512xf32>
    tpu.vector_store %arg13[%c48_71, %c0_72], %67 {strides = array<i32>} : memref<216x512xf32, #tpu.memory_space<vmem>>, vector<24x512xf32>,
    %c2_i32_73 = arith.constant 2 : i32
    %69 = tpu.dynamic_rotate %62 by %c2_i32_73 dim 1 : vector<24x512xf32>, i32 -> vector<24x512xf32>
    %c72 = arith.constant 72 : index
    %c0_74 = arith.constant 0 : index
    %70 = vector.load %arg13[%c72, %c0_74] : memref<216x512xf32, #tpu.memory_space<vmem>>, vector<24x512xf32>
    tpu.vector_store %arg13[%c72, %c0_74], %69 {strides = array<i32>} : memref<216x512xf32, #tpu.memory_space<vmem>>, vector<24x512xf32>,
    %c0_i32_75 = arith.constant 0 : i32
    %71 = tpu.dynamic_rotate %62 by %c0_i32_75 dim 1 : vector<24x512xf32>, i32 -> vector<24x512xf32>
    %c96_76 = arith.constant 96 : index
    %c0_77 = arith.constant 0 : index
    %72 = vector.load %arg13[%c96_76, %c0_77] : memref<216x512xf32, #tpu.memory_space<vmem>>, vector<24x512xf32>
    tpu.vector_store %arg13[%c96_76, %c0_77], %71 {strides = array<i32>} : memref<216x512xf32, #tpu.memory_space<vmem>>, vector<24x512xf32>,
    %c510_i32_78 = arith.constant 510 : i32
    %73 = tpu.dynamic_rotate %62 by %c510_i32_78 dim 1 : vector<24x512xf32>, i32 -> vector<24x512xf32>
    %c120 = arith.constant 120 : index
    %c0_79 = arith.constant 0 : index
    %74 = vector.load %arg13[%c120, %c0_79] : memref<216x512xf32, #tpu.memory_space<vmem>>, vector<24x512xf32>
    tpu.vector_store %arg13[%c120, %c0_79], %73 {strides = array<i32>} : memref<216x512xf32, #tpu.memory_space<vmem>>, vector<24x512xf32>,
    %c474_i32_80 = arith.constant 474 : i32
    %75 = tpu.dynamic_rotate %62 by %c474_i32_80 dim 1 : vector<24x512xf32>, i32 -> vector<24x512xf32>
    %c144 = arith.constant 144 : index
    %c0_81 = arith.constant 0 : index
    %76 = vector.load %arg13[%c144, %c0_81] : memref<216x512xf32, #tpu.memory_space<vmem>>, vector<24x512xf32>
    tpu.vector_store %arg13[%c144, %c0_81], %75 {strides = array<i32>} : memref<216x512xf32, #tpu.memory_space<vmem>>, vector<24x512xf32>,
    %c472_i32_82 = arith.constant 472 : i32
    %77 = tpu.dynamic_rotate %62 by %c472_i32_82 dim 1 : vector<24x512xf32>, i32 -> vector<24x512xf32>
    %c168 = arith.constant 168 : index
    %c0_83 = arith.constant 0 : index
    %78 = vector.load %arg13[%c168, %c0_83] : memref<216x512xf32, #tpu.memory_space<vmem>>, vector<24x512xf32>
    tpu.vector_store %arg13[%c168, %c0_83], %77 {strides = array<i32>} : memref<216x512xf32, #tpu.memory_space<vmem>>, vector<24x512xf32>,
    %c470_i32_84 = arith.constant 470 : i32
    %79 = tpu.dynamic_rotate %62 by %c470_i32_84 dim 1 : vector<24x512xf32>, i32 -> vector<24x512xf32>
    %c192 = arith.constant 192 : index
    %c0_85 = arith.constant 0 : index
    %80 = vector.load %arg13[%c192, %c0_85] : memref<216x512xf32, #tpu.memory_space<vmem>>, vector<24x512xf32>
    tpu.vector_store %arg13[%c192, %c0_85], %79 {strides = array<i32>} : memref<216x512xf32, #tpu.memory_space<vmem>>, vector<24x512xf32>,
    %c0_86 = arith.constant 0 : index
    %c0_87 = arith.constant 0 : index
    %81 = vector.load %arg7[%c0_86, %c0_87] : memref<8x216xf32, #tpu.memory_space<vmem>>, vector<8x216xf32>
    %c0_88 = arith.constant 0 : index
    %c0_89 = arith.constant 0 : index
    %82 = vector.load %arg13[%c0_88, %c0_89] : memref<216x512xf32, #tpu.memory_space<vmem>>, vector<216x512xf32>
    %cst_90 = arith.constant dense<0.000000e+00> : vector<8x512xf32>
    %83 = tpu.matmul %81, %82, %cst_90 {dimension_numbers = #tpu.dot_dimension_numbers<[1], [0], [0], [1], [0, 0, 1, 1], [], []>} : vector<8x216xf32>, vector<216x512xf32>, vector<8x512xf32> -> vector<8x512xf32>
    %c0_91 = arith.constant 0 : index
    %c0_92 = arith.constant 0 : index
    %84 = vector.load %arg8[%c0_91, %c0_92] : memref<8x1xf32, #tpu.memory_space<vmem>>, vector<8x1xf32>
    %85 = vector.broadcast %84 : vector<8x1xf32> to vector<8x512xf32>
    %86 = arith.addf %83, %85 : vector<8x512xf32>
    %cst_93 = arith.constant 0.000000e+00 : f32
    %87 = vector.broadcast %cst_93 : f32 to vector<8x512xf32>
    %88 = arith.maximumf %86, %87 : vector<8x512xf32>
    %89 = arith.mulf %88, %0 : vector<8x512xf32>
    %c24_94 = arith.constant 24 : index
    %c0_95 = arith.constant 0 : index
    %90 = vector.load %arg12[%c24_94, %c0_95] : memref<32x512xf32, #tpu.memory_space<vmem>>, vector<8x512xf32>
    tpu.vector_store %arg12[%c24_94, %c0_95], %89 {strides = array<i32>} : memref<32x512xf32, #tpu.memory_space<vmem>>, vector<8x512xf32>,
    %c0_96 = arith.constant 0 : index
    %c0_97 = arith.constant 0 : index
    %91 = vector.load %arg9[%c0_96, %c0_97] : memref<8x32xf32, #tpu.memory_space<vmem>>, vector<8x32xf32>
    %c0_98 = arith.constant 0 : index
    %c0_99 = arith.constant 0 : index
    %92 = vector.load %arg12[%c0_98, %c0_99] : memref<32x512xf32, #tpu.memory_space<vmem>>, vector<32x512xf32>
    %cst_100 = arith.constant dense<0.000000e+00> : vector<8x512xf32>
    %93 = tpu.matmul %91, %92, %cst_100 {dimension_numbers = #tpu.dot_dimension_numbers<[1], [0], [0], [1], [0, 0, 1, 1], [], []>} : vector<8x32xf32>, vector<32x512xf32>, vector<8x512xf32> -> vector<8x512xf32>
    %c0_101 = arith.constant 0 : index
    %c0_102 = arith.constant 0 : index
    %94 = vector.load %arg10[%c0_101, %c0_102] : memref<8x1xf32, #tpu.memory_space<vmem>>, vector<8x1xf32>
    %95 = vector.broadcast %94 : vector<8x1xf32> to vector<8x512xf32>
    %96 = arith.addf %93, %95 : vector<8x512xf32>
    %c0_103 = arith.constant 0 : index
    %c0_104 = arith.constant 0 : index
    %97 = vector.load %arg12[%c0_103, %c0_104] : memref<32x512xf32, #tpu.memory_space<vmem>>, vector<8x512xf32>
    %98 = arith.addf %96, %97 : vector<8x512xf32>
    %c0_105 = arith.constant 0 : index
    %c0_106 = arith.constant 0 : index
    %c0_107 = arith.constant 0 : index
    %99 = vector.load %arg11[%c0_105, %c0_106, %c0_107] : memref<1x8x512xf32, #tpu.memory_space<vmem>>, vector<1x8x512xf32>
    %100 = vector.shape_cast %99 : vector<1x8x512xf32> to vector<8x512xf32>
    %101 = vector.shape_cast %98 : vector<8x512xf32> to vector<1x8x512xf32>
    tpu.vector_store %arg11[%c0_105, %c0_106, %c0_107], %101 {strides = array<i32>} : memref<1x8x512xf32, #tpu.memory_space<vmem>>, vector<1x8x512xf32>,
    return
  }
  func.func @transform_0(%arg0: i32) -> (i32, i32, i32) {
    %c0_i32 = arith.constant 0 : i32
    %c0_i32_0 = arith.constant 0 : i32
    %c0_i32_1 = arith.constant 0 : i32
    return %arg0, %c0_i32, %c0_i32_0 : i32, i32, i32
  }
  func.func @transform_1(%arg0: i32) -> (i32, i32) {
    %c0_i32 = arith.constant 0 : i32
    %c0_i32_0 = arith.constant 0 : i32
    %c0_i32_1 = arith.constant 0 : i32
    return %c0_i32, %c0_i32_0 : i32, i32
  }
  func.func @transform_2(%arg0: i32) -> (i32, i32) {
    %c0_i32 = arith.constant 0 : i32
    %c0_i32_0 = arith.constant 0 : i32
    %c0_i32_1 = arith.constant 0 : i32
    return %c0_i32, %c0_i32_0 : i32, i32
  }
  func.func @transform_3(%arg0: i32) -> (i32, i32) {
    %c0_i32 = arith.constant 0 : i32
    %c0_i32_0 = arith.constant 0 : i32
    %c0_i32_1 = arith.constant 0 : i32
    return %c0_i32, %c0_i32_0 : i32, i32
  }
  func.func @transform_4(%arg0: i32) -> (i32, i32) {
    %c0_i32 = arith.constant 0 : i32
    %c0_i32_0 = arith.constant 0 : i32
    %c0_i32_1 = arith.constant 0 : i32
    return %c0_i32, %c0_i32_0 : i32, i32
  }
  func.func @transform_5(%arg0: i32) -> (i32, i32) {
    %c0_i32 = arith.constant 0 : i32
    %c0_i32_0 = arith.constant 0 : i32
    %c0_i32_1 = arith.constant 0 : i32
    return %c0_i32, %c0_i32_0 : i32, i32
  }
  func.func @transform_6(%arg0: i32) -> (i32, i32) {
    %c0_i32 = arith.constant 0 : i32
    %c0_i32_0 = arith.constant 0 : i32
    %c0_i32_1 = arith.constant 0 : i32
    return %c0_i32, %c0_i32_0 : i32, i32
  }
  func.func @transform_7(%arg0: i32) -> (i32, i32) {
    %c0_i32 = arith.constant 0 : i32
    %c0_i32_0 = arith.constant 0 : i32
    %c0_i32_1 = arith.constant 0 : i32
    return %c0_i32, %c0_i32_0 : i32, i32
  }
  func.func @transform_8(%arg0: i32) -> (i32, i32) {
    %c0_i32 = arith.constant 0 : i32
    %c0_i32_0 = arith.constant 0 : i32
    %c0_i32_1 = arith.constant 0 : i32
    return %c0_i32, %c0_i32_0 : i32, i32
  }
  func.func @transform_9(%arg0: i32) -> (i32, i32) {
    %c0_i32 = arith.constant 0 : i32
    %c0_i32_0 = arith.constant 0 : i32
    %c0_i32_1 = arith.constant 0 : i32
    return %c0_i32, %c0_i32_0 : i32, i32
  }
  func.func @transform_10(%arg0: i32) -> (i32, i32, i32) {
    %c0_i32 = arith.constant 0 : i32
    %c0_i32_0 = arith.constant 0 : i32
    %c0_i32_1 = arith.constant 0 : i32
    return %arg0, %c0_i32, %c0_i32_0 : i32, i32, i32
  }
}

</mosaic_0001>

<bundles_post_ra>
// kernel: drdb_forward.1
= control target key start
LH: loop header
LB: loop body
LE: loop exit
PB: predicated region body
PF: predicated region fallthrough
CT: control target
= control target key end

     0   :  { %s2269_s13 = smov 0   ;;  %s3557_s0 = inlined_call_operand.vmem [shape: f32[2,8,512], index: 0, kind: input, shape index: {}]   ;;  %s3558_s1 = inlined_call_operand.vmem [shape: f32[8,512], index: 1, kind: input, shape index: {}]   ;;  %s3559_s2 = inlined_call_operand.vmem [shape: f32[8,72], index: 2, kind: input, shape index: {}]   ;;  %s3560_s3 = inlined_call_operand.vmem [shape: f32[8,1], index: 3, kind: input, shape index: {}]   ;;  %s3561_s4 = inlined_call_operand.vmem [shape: f32[8,144], index: 4, kind: input, shape index: {}]   ;;  %s3562_s5 = inlined_call_operand.vmem [shape: f32[8,1], index: 5, kind: input, shape index: {}]   ;;  %s3563_s6 = inlined_call_operand.vmem [shape: f32[8,216], index: 6, kind: input, shape index: {}]   ;;  %s3564_s7 = inlined_call_operand.vmem [shape: f32[8,1], index: 7, kind: input, shape index: {}]   ;;  %s3565_s8 = inlined_call_operand.vmem [shape: f32[8,32], index: 8, kind: input, shape index: {}]   ;;  %s3566_s9 = inlined_call_operand.vmem [shape: f32[8,1], index: 9, kind: input, shape index: {}]   ;;  %s3567_s10 = inlined_call_operand.vmem [shape: f32[2,8,512], index: 10, kind: output, shape index: {}]  }
   0x1 LB: > { %s2147_s14 = sadd.s32 4294967295, %s2202_s13   ;;  %p2151_p0 = scmp.ge.s32.totalorder %s2202_s13, 1  ;;  %s2202_s13 = sphi %s2269_s13, %s20_s13  }
   0x2   : > { %p312_p1 = scmp.lt.s32.totalorder %s2202_s13, 3 }
   0x4   : > { %p313_p2 = pnand %p2151_p0, %p312_p1 }
   0x6   : > { %316 = sbr.rel (%p313_p2) target bundleno = 1367 (0x557), region = 60 }
   0xb   : > { %p350_p3 = scmp.lt.s32.totalorder %s2147_s14, 1  ;;  %s2204_s19 = smov 86   ;;  %v3568_v4 = vmov 0.0   ;;  %v2212_v5 = vmov 0   ;;  %v555_v6 = vld [vmem:[%s3560_s3] sm:$0xff]  ;;  %v384_v7 = vlaneseq  ;;  %vm561_vm8 = vcmask 588800  }
   0xc   : > { %s2205_s20 = smov 88   ;;  %s2206_s21 = smov 90   ;;  %629 = vmatprep.mubr.f32.mxu0 %v3568_v4  ;;  %700 = vmatprep.mubr.f32.mxu1 %v3568_v4  ;;  %vm1071_vm9 = vcmask 130048   ;;  %vm1753_vm10 = vcmask 719872   ;;  %vm1934_vm11 = vcmask 261120  }
   0xd   : > { %s3604_s14 = smov (!%p350_p3, %s2147_s14), 1  ;;  %s2207_s22 = smov 126   ;;  %2186 = vset.pattern.permute.xlu0 %v2212_v5  ;;  %2187 = vset.pattern.permute.xlu1 %v2212_v5  ;;  %v2414_v8 = vand.u32 127, %v384_v7 }
   0xe   : > { %s2166_s15 = sshll.u32 %s3604_s14, 5  ;;  %s2208_s23 = smov 2  }
   0xf   : > { %s2285_s18 = scalar_lea.vmem %s3557_s0, %s2166_s15  ;;  %s2209_s24 = smov 38   ;;  %vm509_vm0 = vcmp.lt.s32.totalorder %v2414_v8, 86  ;;  %vm492_vm1 = vcmp.lt.s32.totalorder %v2414_v8, 88  ;;  %vm475_vm2 = vcmp.lt.s32.totalorder %v2414_v8, 90  ;;  %vm458_vm3 = vcmp.lt.s32.totalorder %v2414_v8, 126 }
  0x10   : > { %v2288_v0 = vld [vmem:[%s2285_s18 + $0x10] sm:$0xff]  ;;  %v2291_v1 = vld [vmem:[%s2285_s18] sm:$0xff]  ;;  %v2298_v2 = vld [vmem:[%s2285_s18 + $0x18] sm:$0xff]  ;;  %s2210_s25 = smov 40   ;;  %s2213_s26 = smov 42   ;;  %vm437_vm4 = vcmp.lt.s32.totalorder %v2414_v8, 2 }
  0x11   : > { %505 = vrot.lane.b32.xlu1 %v2288_v0, %s2204_s19  ;;  %501 = vrot.lane.b32.xlu0 %v2291_v1, %s2204_s19  ;;  %v2301_v3 = vld [vmem:[%s2285_s18 + $0x8] sm:$0xff]  ;;  %vm420_vm5 = vcmp.lt.s32.totalorder %v2414_v8, 38  ;;  %vm403_vm6 = vcmp.lt.s32.totalorder %v2414_v8, 40  ;;  %vm386_vm7 = vcmp.lt.s32.totalorder %v2414_v8, 42 }
  0x15   : > { %507 = vrot.lane.b32.xlu1 %v2298_v2, %s2204_s19  ;;  %503 = vrot.lane.b32.xlu0 %v2301_v3, %s2204_s19 }
  0x19   : > { %486 = vrot.lane.b32.xlu1 %v2301_v3, %s2205_s20  ;;  %484 = vrot.lane.b32.xlu0 %v2291_v1, %s2205_s20 }
  0x1d   : > { %490 = vrot.lane.b32.xlu1 %v2298_v2, %s2205_s20  ;;  %488 = vrot.lane.b32.xlu0 %v2288_v0, %s2205_s20 }
  0x21   : > { %469 = vrot.lane.b32.xlu1 %v2301_v3, %s2206_s21  ;;  %467 = vrot.lane.b32.xlu0 %v2291_v1, %s2206_s21 }
  0x25   : > { %473 = vrot.lane.b32.xlu1 %v2298_v2, %s2206_s21  ;;  %471 = vrot.lane.b32.xlu0 %v2288_v0, %s2206_s21 }
  0x29   : > { %452 = vrot.lane.b32.xlu1 %v2301_v3, %s2207_s22  ;;  %450 = vrot.lane.b32.xlu0 %v2291_v1, %s2207_s22 }
  0x2d   : > { %456 = vrot.lane.b32.xlu1 %v2298_v2, %s2207_s22  ;;  %454 = vrot.lane.b32.xlu0 %v2288_v0, %s2207_s22 }
  0x31   : > { %431 = vrot.lane.b32.xlu1 %v2301_v3, %s2208_s23  ;;  %429 = vrot.lane.b32.xlu0 %v2291_v1, %s2208_s23 }
  0x35   : > { %435 = vrot.lane.b32.xlu1 %v2298_v2, %s2208_s23  ;;  %433 = vrot.lane.b32.xlu0 %v2288_v0, %s2208_s23 }
  0x39   : > { %414 = vrot.lane.b32.xlu1 %v2301_v3, %s2209_s24  ;;  %412 = vrot.lane.b32.xlu0 %v2291_v1, %s2209_s24 }
  0x3d   : > { %418 = vrot.lane.b32.xlu1 %v2298_v2, %s2209_s24  ;;  %416 = vrot.lane.b32.xlu0 %v2288_v0, %s2209_s24 }
  0x41   : > { %397 = vrot.lane.b32.xlu1 %v2301_v3, %s2210_s25  ;;  %395 = vrot.lane.b32.xlu0 %v2291_v1, %s2210_s25 }
  0x45   : > { %401 = vrot.lane.b32.xlu1 %v2298_v2, %s2210_s25  ;;  %399 = vrot.lane.b32.xlu0 %v2288_v0, %s2210_s25 }
  0x49   : > { %378 = vrot.lane.b32.xlu1 %v2301_v3, %s2213_s26  ;;  %376 = vrot.lane.b32.xlu0 %v2291_v1, %s2213_s26 }
  0x4d   : > { %382 = vrot.lane.b32.xlu1 %v2298_v2, %s2213_s26  ;;  %380 = vrot.lane.b32.xlu0 %v2288_v0, %s2213_s26 }
  0x51   : > { %558 = vperm.xlu0 %2186, %v555_v6   ;;  %931 = vrot.lane.b32.xlu1 %v2301_v3, %s2205_s20 }
  0x55   : > { %927 = vrot.lane.b32.xlu0 %v2291_v1, %s2205_s20  ;;  %939 = vrot.lane.b32.xlu1 %v2298_v2, %s2205_s20 }
  0x59   : > { %935 = vrot.lane.b32.xlu0 %v2288_v0, %s2205_s20  ;;  %899 = vrot.lane.b32.xlu1 %v2301_v3, %s2206_s21 }
  0x5d   : > { %895 = vrot.lane.b32.xlu0 %v2291_v1, %s2206_s21  ;;  %907 = vrot.lane.b32.xlu1 %v2298_v2, %s2206_s21 }
  0x61   : > { %903 = vrot.lane.b32.xlu0 %v2288_v0, %s2206_s21  ;;  %867 = vrot.lane.b32.xlu1 %v2301_v3, %s2207_s22 }
  0x65   : > { %863 = vrot.lane.b32.xlu0 %v2291_v1, %s2207_s22  ;;  %875 = vrot.lane.b32.xlu1 %v2298_v2, %s2207_s22 }
  0x69   : > { %871 = vrot.lane.b32.xlu0 %v2288_v0, %s2207_s22  ;;  %827 = vrot.lane.b32.xlu1 %v2301_v3, %s2208_s23 }
  0x6d   : > { %823 = vrot.lane.b32.xlu0 %v2291_v1, %s2208_s23  ;;  %835 = vrot.lane.b32.xlu1 %v2298_v2, %s2208_s23 }
  0x71   : > { %831 = vrot.lane.b32.xlu0 %v2288_v0, %s2208_s23  ;;  %795 = vrot.lane.b32.xlu1 %v2301_v3, %s2209_s24 }
  0x75   : > { %791 = vrot.lane.b32.xlu0 %v2291_v1, %s2209_s24  ;;  %803 = vrot.lane.b32.xlu1 %v2298_v2, %s2209_s24 }
  0x79   : > { %799 = vrot.lane.b32.xlu0 %v2288_v0, %s2209_s24  ;;  %763 = vrot.lane.b32.xlu1 %v2301_v3, %s2210_s25 }
  0x7d   : > { %759 = vrot.lane.b32.xlu0 %v2291_v1, %s2210_s25  ;;  %771 = vrot.lane.b32.xlu1 %v2298_v2, %s2210_s25 }
  0x81   : > { %767 = vrot.lane.b32.xlu0 %v2288_v0, %s2210_s25  ;;  %731 = vrot.lane.b32.xlu1 %v2301_v3, %s2213_s26 }
  0x83   : > { %v506_v9 = vpop.permute.xlu1 %505  ;;  %v502_v10 = vpop.permute.xlu0 %501 }
  0x85   : > { %727 = vrot.lane.b32.xlu0 %v2291_v1, %s2213_s26  ;;  %739 = vrot.lane.b32.xlu1 %v2298_v2, %s2213_s26 }
  0x87   : > { %v508_v11 = vpop.permute.xlu1 %507  ;;  %v504_v12 = vpop.permute.xlu0 %503 }
  0x88   : > { %v511_v13 = vsel %vm509_vm0, %v504_v12, %v506_v9  ;;  %v513_v14 = vsel %vm509_vm0, %v508_v11, %v502_v10  ;;  %v512_v15 = vsel %vm509_vm0, %v502_v10, %v504_v12  ;;  %v510_v16 = vsel %vm509_vm0, %v506_v9, %v508_v11  ;;  %v518_v12 = vld [vmem:[%s3559_s2] sm:$0xff] }
  0x89   : > { %579 = vmatprep.subr.mxu0 %v511_v13  ;;  %650 = vmatprep.subr.mxu1 %v513_v14 }
  0x8a   : > { %580 = vmatpush1.msra.mxu0 %v512_v15  ;;  %651 = vmatpush1.msra.mxu1 %v510_v16 }
  0x8b   : > { %v487_v17 = vpop.permute.xlu1 %486  ;;  %v485_v18 = vpop.permute.xlu0 %484  ;;  %735 = vrot.lane.b32.xlu0 %v2288_v0, %s2213_s26  ;;  %963 = vrot.lane.b32.xlu1 %v2301_v3, %s2204_s19 }
  0x8c   : > { %v495_v24 = vsel %vm492_vm1, %v485_v18, %v487_v17 }
  0x8f   : > { %v491_v19 = vpop.permute.xlu1 %490  ;;  %v489_v20 = vpop.permute.xlu0 %488  ;;  %959 = vrot.lane.b32.xlu0 %v2291_v1, %s2204_s19 }
  0x90   : > { %v494_v21 = vsel %vm492_vm1, %v487_v17, %v489_v20  ;;  %v496_v22 = vsel %vm492_vm1, %v491_v19, %v485_v18  ;;  %v493_v23 = vsel %vm492_vm1, %v489_v20, %v491_v19  ;;  %v2512_v20 = vld [vmem:[%s3558_s1] sm:$0xff] }
  0x91   : > { %581 = vmatprep.subr.mxu0 %v494_v21  ;;  %652 = vmatprep.subr.mxu1 %v496_v22 }
  0x92   : > { %582 = vmatpush1.msra.mxu0 %v495_v24  ;;  %653 = vmatpush1.msra.mxu1 %v493_v23  ;;  %v2517_v24 = vld [vmem:[%s3558_s1 + $0x10] sm:$0xff] }
  0x93   : > { %v470_v25 = vpop.permute.xlu1 %469  ;;  %v468_v26 = vpop.permute.xlu0 %467 }
  0x94   : > { %v478_v32 = vsel %vm475_vm2, %v468_v26, %v470_v25 }
  0x97   : > { %v474_v27 = vpop.permute.xlu1 %473  ;;  %v472_v28 = vpop.permute.xlu0 %471 }
  0x98   : > { %v477_v29 = vsel %vm475_vm2, %v470_v25, %v472_v28  ;;  %v479_v30 = vsel %vm475_vm2, %v474_v27, %v468_v26  ;;  %v476_v31 = vsel %vm475_vm2, %v472_v28, %v474_v27 }
  0x99   : > { %583 = vmatprep.subr.mxu0 %v477_v29  ;;  %654 = vmatprep.subr.mxu1 %v479_v30 }
  0x9a   : > { %584 = vmatpush1.msra.mxu0 %v478_v32  ;;  %655 = vmatpush1.msra.mxu1 %v476_v31  ;;  %v2528_v32 = vld [vmem:[%s3558_s1 + $0x8] sm:$0xff] }
  0x9b   : > { %v453_v33 = vpop.permute.xlu1 %452  ;;  %v451_v34 = vpop.permute.xlu0 %450 }
  0x9c   : > { %v461_v40 = vsel %vm458_vm3, %v451_v34, %v453_v33 }
  0x9f   : > { %v457_v35 = vpop.permute.xlu1 %456  ;;  %v455_v36 = vpop.permute.xlu0 %454 }
  0xa0   : > { %v460_v37 = vsel %vm458_vm3, %v453_v33, %v455_v36  ;;  %v462_v38 = vsel %vm458_vm3, %v457_v35, %v451_v34  ;;  %v459_v39 = vsel %vm458_vm3, %v455_v36, %v457_v35  ;;  %v2540_v35 = vld [vmem:[%s3558_s1 + $0x18] sm:$0xff] }
  0xa1   : > { %585 = vmatprep.subr.mxu0 %v460_v37  ;;  %656 = vmatprep.subr.mxu1 %v462_v38 }
  0xa2   : > { %586 = vmatpush1.msra.mxu0 %v461_v40  ;;  %657 = vmatpush1.msra.mxu1 %v459_v39 }
  0xa3   : > { %v432_v41 = vpop.permute.xlu1 %431  ;;  %587 = vmatprep.subr.mxu0 %v2301_v3  ;;  %v430_v42 = vpop.permute.xlu0 %429  ;;  %658 = vmatprep.subr.mxu1 %v2298_v2 }
  0xa4   : > { %588 = vmatpush1.msra.mxu0 %v2291_v1  ;;  %v440_v43 = vsel %vm437_vm4, %v430_v42, %v432_v41  ;;  %659 = vmatpush1.msra.mxu1 %v2288_v0 }
  0xa5   : > { %589 = vmatprep.subr.mxu0 %v440_v43 }
  0xa7   : > { %v436_v44 = vpop.permute.xlu1 %435  ;;  %v434_v45 = vpop.permute.xlu0 %433 }
  0xa8   : > { %v441_v46 = vsel %vm437_vm4, %v436_v44, %v430_v42  ;;  %v438_v47 = vsel %vm437_vm4, %v434_v45, %v436_v44  ;;  %v439_v48 = vsel %vm437_vm4, %v432_v41, %v434_v45 }
  0xa9   : > { %590 = vmatpush1.msra.mxu0 %v441_v46  ;;  %660 = vmatprep.subr.mxu1 %v438_v47  ;;  %v992_v47 = vld [vmem:[%s3561_s4 + $0x8] sm:$0xff] }
  0xaa   : > { %661 = vmatpush1.msra.mxu1 %v439_v48 }
  0xab   : > { %v415_v49 = vpop.permute.xlu1 %414  ;;  %v413_v50 = vpop.permute.xlu0 %412 }
  0xac   : > { %v423_v51 = vsel %vm420_vm5, %v413_v50, %v415_v49 }
  0xad   : > { %591 = vmatprep.subr.mxu0 %v423_v51  ;;  %v1065_v51 = vld [vmem:[%s3562_s5] sm:$0xff] }
  0xaf   : > { %v419_v52 = vpop.permute.xlu1 %418  ;;  %v417_v53 = vpop.permute.xlu0 %416 }
  0xb0   : > { %v424_v54 = vsel %vm420_vm5, %v419_v52, %v413_v50  ;;  %v421_v55 = vsel %vm420_vm5, %v417_v53, %v419_v52  ;;  %v422_v56 = vsel %vm420_vm5, %v415_v49, %v417_v53 }
  0xb1   : > { %592 = vmatpush1.msra.mxu0 %v424_v54  ;;  %662 = vmatprep.subr.mxu1 %v421_v55 }
  0xb2   : > { %663 = vmatpush1.msra.mxu1 %v422_v56 }
  0xb3   : > { %v398_v57 = vpop.permute.xlu1 %397  ;;  %v396_v58 = vpop.permute.xlu0 %395 }
  0xb4   : > { %v406_v59 = vsel %vm403_vm6, %v396_v58, %v398_v57 }
  0xb5   : > { %593 = vmatprep.subr.mxu0 %v406_v59 }
  0xb7   : > { %v402_v60 = vpop.permute.xlu1 %401  ;;  %v400_v61 = vpop.permute.xlu0 %399 }
  0xb8   : > { %v407_v62 = vsel %vm403_vm6, %v402_v60, %v396_v58  ;;  %v404_v63 = vsel %vm403_vm6, %v400_v61, %v402_v60  ;;  %v405_v5 = vsel %vm403_vm6, %v398_v57, %v400_v61 }
  0xb9   : > { %594 = vmatpush1.msra.mxu0 %v407_v62  ;;  %664 = vmatprep.subr.mxu1 %v404_v63 }
  0xba   : > { %665 = vmatpush1.msra.mxu1 %v405_v5 }
  0xbb   : > { %v379_v6 = vpop.permute.xlu1 %378  ;;  %v377_v7 = vpop.permute.xlu0 %376 }
  0xbc   : > { %v389_v9 = vsel %vm386_vm7, %v377_v7, %v379_v6 }
  0xbd   : > { %595 = vmatprep.subr.mxu0 %v389_v9 }
  0xbf   : > { %v383_v10 = vpop.permute.xlu1 %382  ;;  %v381_v11 = vpop.permute.xlu0 %380 }
  0xc0   : > { %v390_v13 = vsel %vm386_vm7, %v383_v10, %v377_v7  ;;  %v387_v14 = vsel %vm386_vm7, %v381_v11, %v383_v10  ;;  %v388_v15 = vsel %vm386_vm7, %v379_v6, %v381_v11 }
  0xc1   : > { %596 = vmatpush1.msra.mxu0 %v390_v13  ;;  %666 = vmatprep.subr.mxu1 %v387_v14 }
  0xc2   : > { %2156 = vmatmul.mubr.msk.f32.vlgmr.msra.gmra.mxu0 %vm561_vm8, %v518_v12  ;;  %667 = vmatpush1.msra.mxu1 %v388_v15 }
  0xc3   : > { %2157 = vmatmul.mubr.msk.f32.vlgmr.msra.gmra.mxu1 %vm561_vm8, %v518_v12  ;;  %v2567_v37 = vpop.permute.xlu1 %931  ;;  %2158 = vmatprep.mubr.msk.f32.mxu0 %vm1071_vm9, %v992_v47 }
  0xc4   : > { %2159 = vmatprep.mubr.msk.f32.mxu1 %vm1071_vm9, %v992_v47 }
  0xc7   : > { %v2577_v39 = vpop.permute.xlu1 %939 }
  0xcb   : > { %v2587_v41 = vpop.permute.xlu1 %899 }
  0xcc   : > { %v559_v16 = vpop.permute.xlu0 %558 }
  0xcf   : > { %v2597_v43 = vpop.permute.xlu1 %907 }
  0xd0   : > { %v2571_v38 = vpop.permute.xlu0 %927 }
  0xd3   : > { %v2607_v45 = vpop.permute.xlu1 %867 }
  0xd4   : > { %v2583_v40 = vpop.permute.xlu0 %935 }
  0xd7   : > { %v2620_v48 = vpop.permute.xlu1 %875 }
  0xd8   : > { %v2591_v42 = vpop.permute.xlu0 %895 }
  0xdb   : > { %v2630_v50 = vpop.permute.xlu1 %827 }
  0xdc   : > { %v2603_v44 = vpop.permute.xlu0 %903 }
  0xdf   : > { %v2641_v53 = vpop.permute.xlu1 %835 }
  0xe0   : > { %v2611_v46 = vpop.permute.xlu0 %863 }
  0xe3   : > { %v2651_v55 = vpop.permute.xlu1 %795 }
  0xe4   : > { %v2626_v49 = vpop.permute.xlu0 %871 }
  0xe7   : > { %v2661_v57 = vpop.permute.xlu1 %803 }
  0xe8   : > { %v2637_v52 = vpop.permute.xlu0 %823 }
  0xeb   : > { %v2671_v59 = vpop.permute.xlu1 %763 }
  0xec   : > { %v2647_v54 = vpop.permute.xlu0 %831 }
  0xef   : > { %v2681_v61 = vpop.permute.xlu1 %771 }
  0xf0   : > { %v2655_v56 = vpop.permute.xlu0 %791 }
  0xf3   : > { %v2691_v63 = vpop.permute.xlu1 %731 }
  0xf4   : > { %v2667_v58 = vpop.permute.xlu0 %799 }
  0xf7   : > { %v2701_v6 = vpop.permute.xlu1 %739 }
  0xf8   : > { %v2675_v60 = vpop.permute.xlu0 %759 }
  0xfc   : > { %v2687_v62 = vpop.permute.xlu0 %767 }
  0xfd   : > { %v2711_v9 = vpop.permute.xlu1 %963 }
 0x100   : > { %v2695_v5 = vpop.permute.xlu0 %727 }
 0x104   : > { %v2705_v7 = vpop.permute.xlu0 %735 }
 0x108   : > { %v2715_v10 = vpop.permute.xlu0 %959 }
 0x182   : > { %v631_v17 = vpop.f32.mrf.mxu0 }
 0x183   : > { %v632_v18 = vadd.f32 %v631_v17, %v559_v16  ;;  %v702_v19 = vpop.f32.mrf.mxu1  ;;  %v945_v17 = vsel %vm492_vm1, %v2567_v37, %v2583_v40 }
 0x184   : > { %v703_v21 = vadd.f32 %v702_v19, %v559_v16  ;;  %v633_v22 = vpop.f32.mrf.mxu0  ;;  %v947_v19 = vsel %vm492_vm1, %v2571_v38, %v2567_v37  ;;  %v913_v37 = vsel %vm475_vm2, %v2587_v41, %v2603_v44 }
 0x185   : > { %v707_v23 = vmax.f32 %v632_v18, 0.0  ;;  %v634_v25 = vadd.f32 %v633_v22, %v559_v16  ;;  %v704_v26 = vpop.f32.mrf.mxu1 }
 0x186   : > { %v709_v27 = vmax.f32 %v703_v21, 0.0  ;;  %v705_v30 = vadd.f32 %v704_v26, %v559_v16 }
 0x187   : > { %v2520_v28 = vmul.f32 %v707_v23, %v2512_v20  ;;  %v708_v29 = vmax.f32 %v634_v25, 0.0  ;;  %v949_v25 = vsel %vm492_vm1, %v2577_v39, %v2571_v38 }
 0x188   : > { %v2523_v31 = vmul.f32 %v709_v27, %v2517_v24  ;;  %v710_v34 = vmax.f32 %v705_v30, 0.0  ;;  %v943_v27 = vsel %vm492_vm1, %v2583_v40, %v2577_v39  ;;  %v915_v39 = vsel %vm475_vm2, %v2591_v42, %v2587_v41 }
 0x189   : > { %929 = vrot.lane.b32.xlu1 %v2520_v28, %s2205_s20  ;;  %v2535_v33 = vmul.f32 %v708_v29, %v2528_v32  ;;  %v917_v41 = vsel %vm475_vm2, %v2597_v43, %v2591_v42  ;;  %v881_v42 = vsel %vm458_vm3, %v2607_v45, %v2626_v49 }
 0x18a   : > { %937 = vrot.lane.b32.xlu0 %v2523_v31, %s2205_s20  ;;  %v2547_v36 = vmul.f32 %v710_v34, %v2540_v35 }
 0x18d   : > { %933 = vrot.lane.b32.xlu1 %v2535_v33, %s2205_s20 }
 0x18e   : > { %897 = vrot.lane.b32.xlu0 %v2520_v28, %s2206_s21 }
 0x191   : > { %941 = vrot.lane.b32.xlu1 %v2547_v36, %s2205_s20 }
 0x192   : > { %905 = vrot.lane.b32.xlu0 %v2523_v31, %s2206_s21 }
 0x195   : > { %901 = vrot.lane.b32.xlu1 %v2535_v33, %s2206_s21 }
 0x196   : > { %865 = vrot.lane.b32.xlu0 %v2520_v28, %s2207_s22 }
 0x199   : > { %909 = vrot.lane.b32.xlu1 %v2547_v36, %s2206_s21 }
 0x19a   : > { %873 = vrot.lane.b32.xlu0 %v2523_v31, %s2207_s22 }
 0x19d   : > { %869 = vrot.lane.b32.xlu1 %v2535_v33, %s2207_s22 }
 0x19e   : > { %825 = vrot.lane.b32.xlu0 %v2520_v28, %s2208_s23 }
 0x1a1   : > { %877 = vrot.lane.b32.xlu1 %v2547_v36, %s2207_s22 }
 0x1a2   : > { %833 = vrot.lane.b32.xlu0 %v2523_v31, %s2208_s23 }
 0x1a5   : > { %829 = vrot.lane.b32.xlu1 %v2535_v33, %s2208_s23 }
 0x1a6   : > { %793 = vrot.lane.b32.xlu0 %v2520_v28, %s2209_s24 }
 0x1a9   : > { %837 = vrot.lane.b32.xlu1 %v2547_v36, %s2208_s23 }
 0x1aa   : > { %801 = vrot.lane.b32.xlu0 %v2523_v31, %s2209_s24 }
 0x1ad   : > { %797 = vrot.lane.b32.xlu1 %v2535_v33, %s2209_s24 }
 0x1ae   : > { %761 = vrot.lane.b32.xlu0 %v2520_v28, %s2210_s25 }
 0x1b1   : > { %805 = vrot.lane.b32.xlu1 %v2547_v36, %s2209_s24 }
 0x1b2   : > { %769 = vrot.lane.b32.xlu0 %v2523_v31, %s2210_s25 }
 0x1b5   : > { %765 = vrot.lane.b32.xlu1 %v2535_v33, %s2210_s25 }
 0x1b6   : > { %729 = vrot.lane.b32.xlu0 %v2520_v28, %s2213_s26 }
 0x1b9   : > { %773 = vrot.lane.b32.xlu1 %v2547_v36, %s2210_s25 }
 0x1ba   : > { %737 = vrot.lane.b32.xlu0 %v2523_v31, %s2213_s26 }
 0x1bd   : > { %733 = vrot.lane.b32.xlu1 %v2535_v33, %s2213_s26 }
 0x1be   : > { %961 = vrot.lane.b32.xlu0 %v2520_v28, %s2204_s19 }
 0x1c1   : > { %741 = vrot.lane.b32.xlu1 %v2547_v36, %s2213_s26 }
 0x1c2   : > { %969 = vrot.lane.b32.xlu0 %v2523_v31, %s2204_s19 }
 0x1c5   : > { %965 = vrot.lane.b32.xlu1 %v2535_v33, %s2204_s19 }
 0x1c6   : > { %967 = vrot.lane.b32.xlu0 %v2288_v0, %s2204_s19 }
 0x1c9   : > { %973 = vrot.lane.b32.xlu1 %v2547_v36, %s2204_s19 }
 0x1ca   : > { %1068 = vperm.xlu0 %2186, %v1065_v51  }
 0x1cd   : > { %971 = vrot.lane.b32.xlu1 %v2298_v2, %s2204_s19 }
 0x1ce   : > { %1451 = vrot.lane.b32.xlu0 %v2301_v3, %s2207_s22 }
 0x1d1   : > { %1445 = vrot.lane.b32.xlu1 %v2291_v1, %s2207_s22 }
 0x1d2   : > { %1463 = vrot.lane.b32.xlu0 %v2298_v2, %s2207_s22 }
 0x1d5   : > { %1457 = vrot.lane.b32.xlu1 %v2288_v0, %s2207_s22 }
 0x1d6   : > { %1391 = vrot.lane.b32.xlu0 %v2301_v3, %s2208_s23 }
 0x1d9   : > { %1387 = vrot.lane.b32.xlu1 %v2520_v28, %s2208_s23 }
 0x1da   : > { %1403 = vrot.lane.b32.xlu0 %v2298_v2, %s2208_s23 }
 0x1dd   : > { %1399 = vrot.lane.b32.xlu1 %v2523_v31, %s2208_s23 }
 0x1de   : > { %1343 = vrot.lane.b32.xlu0 %v2301_v3, %s2209_s24 }
 0x1e1   : > { %1385 = vrot.lane.b32.xlu1 %v2291_v1, %s2208_s23 }
 0x1e2   : > { %1355 = vrot.lane.b32.xlu0 %v2298_v2, %s2209_s24 }
 0x1e5   : > { %1397 = vrot.lane.b32.xlu1 %v2288_v0, %s2208_s23 }
 0x1e6   : > { %1295 = vrot.lane.b32.xlu0 %v2301_v3, %s2210_s25 }
 0x1e9   : > { %1339 = vrot.lane.b32.xlu1 %v2520_v28, %s2209_s24 }
 0x1ea   : > { %1307 = vrot.lane.b32.xlu0 %v2298_v2, %s2210_s25 }
 0x1ed   : > { %1351 = vrot.lane.b32.xlu1 %v2523_v31, %s2209_s24 }
 0x1ee   : > { %1247 = vrot.lane.b32.xlu0 %v2301_v3, %s2213_s26 }
 0x1f1   : > { %1337 = vrot.lane.b32.xlu1 %v2291_v1, %s2209_s24 }
 0x1f2   : > { %1259 = vrot.lane.b32.xlu0 %v2298_v2, %s2213_s26 }
 0x1f5   : > { %1349 = vrot.lane.b32.xlu1 %v2288_v0, %s2209_s24 }
 0x1f6   : > { %1595 = vrot.lane.b32.xlu0 %v2301_v3, %s2204_s19 }
 0x1f9   : > { %1291 = vrot.lane.b32.xlu1 %v2520_v28, %s2210_s25 }
 0x1fa   : > { %1607 = vrot.lane.b32.xlu0 %v2298_v2, %s2204_s19 }
 0x1fb   : > { %v930_v11 = vpop.permute.xlu1 %929 }
 0x1fc   : > { %v938_v12 = vpop.permute.xlu0 %937 }
 0x1fd   : > { %1303 = vrot.lane.b32.xlu1 %v2523_v31, %s2210_s25 }
 0x1fe   : > { %1547 = vrot.lane.b32.xlu0 %v2301_v3, %s2205_s20 }
 0x1ff   : > { %v934_v13 = vpop.permute.xlu1 %933 }
 0x200   : > { %v898_v14 = vpop.permute.xlu0 %897  ;;  %v946_v15 = vsel %vm492_vm1, %v934_v13, %v938_v12  ;;  %v948_v16 = vsel %vm492_vm1, %v930_v11, %v934_v13 }
 0x201   : > { %1289 = vrot.lane.b32.xlu1 %v2291_v1, %s2210_s25  ;;  %1075 = vmatprep.subr.mxu0 %v946_v15 }
 0x202   : > { %1559 = vrot.lane.b32.xlu0 %v2298_v2, %s2205_s20  ;;  %1076 = vmatpush1.msra.mxu0 %v948_v16 }
 0x203   : > { %v942_v18 = vpop.permute.xlu1 %941  ;;  %1077 = vmatprep.subr.mxu0 %v945_v17 }
 0x204   : > { %1078 = vmatpush1.msra.mxu0 %v947_v19  ;;  %v906_v21 = vpop.permute.xlu0 %905  ;;  %v950_v22 = vsel %vm492_vm1, %v942_v18, %v930_v11  ;;  %v944_v23 = vsel %vm492_vm1, %v938_v12, %v942_v18  ;;  %v911_v12 = vsel %vm475_vm2, %v2603_v44, %v2597_v43  ;;  %v883_v44 = vsel %vm458_vm3, %v2611_v46, %v2607_v45 }
 0x205   : > { %1301 = vrot.lane.b32.xlu1 %v2288_v0, %s2210_s25  ;;  %1146 = vmatprep.subr.mxu1 %v950_v22  ;;  %v885_v19 = vsel %vm458_vm3, %v2620_v48, %v2611_v46 }
 0x206   : > { %1499 = vrot.lane.b32.xlu0 %v2301_v3, %s2206_s21  ;;  %1147 = vmatpush1.msra.mxu1 %v944_v23 }
 0x207   : > { %v902_v26 = vpop.permute.xlu1 %901  ;;  %1148 = vmatprep.subr.mxu1 %v949_v25  ;;  %v843_v25 = vsel %vm437_vm4, %v2637_v52, %v2630_v50 }
 0x208   : > { %1149 = vmatpush1.msra.mxu1 %v943_v27  ;;  %v866_v29 = vpop.permute.xlu0 %865  ;;  %v914_v30 = vsel %vm475_vm2, %v902_v26, %v906_v21  ;;  %v916_v34 = vsel %vm475_vm2, %v898_v14, %v902_v26 }
 0x209   : > { %1243 = vrot.lane.b32.xlu1 %v2520_v28, %s2213_s26  ;;  %1079 = vmatprep.subr.mxu0 %v914_v30 }
 0x20a   : > { %1511 = vrot.lane.b32.xlu0 %v2298_v2, %s2206_s21  ;;  %1080 = vmatpush1.msra.mxu0 %v916_v34 }
 0x20b   : > { %v910_v38 = vpop.permute.xlu1 %909  ;;  %1081 = vmatprep.subr.mxu0 %v913_v37  ;;  %v841_v37 = vsel %vm437_vm4, %v2630_v50, %v2647_v54  ;;  %v811_v50 = vsel %vm420_vm5, %v2655_v56, %v2651_v55 }
 0x20c   : > { %1082 = vmatpush1.msra.mxu0 %v915_v39  ;;  %v874_v40 = vpop.permute.xlu0 %873  ;;  %v918_v47 = vsel %vm475_vm2, %v910_v38, %v898_v14  ;;  %v912_v51 = vsel %vm475_vm2, %v906_v21, %v910_v38  ;;  %v879_v21 = vsel %vm458_vm3, %v2626_v49, %v2620_v48 }
 0x20d   : > { %1255 = vrot.lane.b32.xlu1 %v2523_v31, %s2213_s26  ;;  %1150 = vmatprep.subr.mxu1 %v918_v47  ;;  %v813_v47 = vsel %vm420_vm5, %v2661_v57, %v2655_v56 }
 0x20e   : > { %1393 = vrot.lane.b32.xlu0 %v2535_v33, %s2208_s23  ;;  %1151 = vmatpush1.msra.mxu1 %v912_v51  ;;  %v807_v51 = vsel %vm420_vm5, %v2667_v58, %v2661_v57 }
 0x20f   : > { %v870_v11 = vpop.permute.xlu1 %869  ;;  %1152 = vmatprep.subr.mxu1 %v917_v41  ;;  %v809_v41 = vsel %vm420_vm5, %v2651_v55, %v2667_v58  ;;  %v779_v58 = vsel %vm403_vm6, %v2675_v60, %v2671_v59 }
 0x210   : > { %1153 = vmatpush1.msra.mxu1 %v911_v12  ;;  %v826_v13 = vpop.permute.xlu0 %825  ;;  %v882_v14 = vsel %vm458_vm3, %v870_v11, %v874_v40  ;;  %v884_v15 = vsel %vm458_vm3, %v866_v29, %v870_v11 }
 0x211   : > { %1241 = vrot.lane.b32.xlu1 %v2291_v1, %s2213_s26  ;;  %1083 = vmatprep.subr.mxu0 %v882_v14 }
 0x212   : > { %1405 = vrot.lane.b32.xlu0 %v2547_v36, %s2208_s23  ;;  %1084 = vmatpush1.msra.mxu0 %v884_v15 }
 0x213   : > { %v878_v43 = vpop.permute.xlu1 %877  ;;  %1085 = vmatprep.subr.mxu0 %v881_v42  ;;  %v781_v42 = vsel %vm403_vm6, %v2681_v61, %v2675_v60 }
 0x214   : > { %1086 = vmatpush1.msra.mxu0 %v883_v44  ;;  %v834_v16 = vpop.permute.xlu0 %833  ;;  %v886_v17 = vsel %vm458_vm3, %v878_v43, %v866_v29  ;;  %v880_v18 = vsel %vm458_vm3, %v874_v40, %v878_v43  ;;  %v839_v29 = vsel %vm437_vm4, %v2647_v54, %v2641_v53  ;;  %v775_v43 = vsel %vm403_vm6, %v2687_v62, %v2681_v61 }
 0x215   : > { %1253 = vrot.lane.b32.xlu1 %v2288_v0, %s2213_s26  ;;  %1087 = vmatprep.subr.mxu0 %v2535_v33  ;;  %v777_v44 = vsel %vm403_vm6, %v2671_v59, %v2687_v62  ;;  %v747_v62 = vsel %vm386_vm7, %v2695_v5, %v2691_v63 }
 0x216   : > { %1154 = vmatprep.subr.mxu1 %v886_v17  ;;  %1345 = vrot.lane.b32.xlu0 %v2535_v33, %s2209_s24 }
 0x217   : > { %1088 = vmatpush1.msra.mxu0 %v2520_v28  ;;  %1155 = vmatpush1.msra.mxu1 %v880_v18  ;;  %v830_v45 = vpop.permute.xlu1 %829 }
 0x218   : > { %1089 = vmatprep.subr.mxu0 %v2301_v3  ;;  %1156 = vmatprep.subr.mxu1 %v885_v19  ;;  %v794_v22 = vpop.permute.xlu0 %793  ;;  %v844_v23 = vsel %vm437_vm4, %v826_v13, %v830_v45  ;;  %v842_v26 = vsel %vm437_vm4, %v830_v45, %v834_v16  ;;  %v749_v19 = vsel %vm386_vm7, %v2701_v6, %v2695_v5 }
 0x219   : > { %1090 = vmatpush1.msra.mxu0 %v2291_v1  ;;  %1157 = vmatpush1.msra.mxu1 %v879_v21  ;;  %v743_v21 = vsel %vm386_vm7, %v2705_v7, %v2701_v6 }
 0x21a   : > { %1591 = vrot.lane.b32.xlu1 %v2520_v28, %s2204_s19  ;;  %1091 = vmatprep.subr.mxu0 %v844_v23 }
 0x21b   : > { %1158 = vmatprep.subr.mxu1 %v2547_v36  ;;  %1357 = vrot.lane.b32.xlu0 %v2547_v36, %s2209_s24  ;;  %v838_v3 = vpop.permute.xlu1 %837 }
 0x21c   : > { %1159 = vmatpush1.msra.mxu1 %v2523_v31  ;;  %v802_v46 = vpop.permute.xlu0 %801  ;;  %v846_v48 = vsel %vm437_vm4, %v838_v3, %v826_v13  ;;  %v840_v49 = vsel %vm437_vm4, %v834_v16, %v838_v3 }
 0x21d   : > { %1160 = vmatprep.subr.mxu1 %v2298_v2  ;;  %1092 = vmatpush1.msra.mxu0 %v846_v48  ;;  %v845_v2 = vsel %vm437_vm4, %v2641_v53, %v2637_v52 }
 0x21e   : > { %1161 = vmatpush1.msra.mxu1 %v2288_v0  ;;  %1603 = vrot.lane.b32.xlu1 %v2523_v31, %s2204_s19 }
 0x21f   : > { %1162 = vmatprep.subr.mxu1 %v840_v49  ;;  %1297 = vrot.lane.b32.xlu0 %v2535_v33, %s2210_s25  ;;  %v798_v27 = vpop.permute.xlu1 %797 }
 0x220   : > { %1093 = vmatprep.subr.mxu0 %v843_v25  ;;  %1163 = vmatpush1.msra.mxu1 %v842_v26  ;;  %v762_v30 = vpop.permute.xlu0 %761  ;;  %v812_v34 = vsel %vm420_vm5, %v794_v22, %v798_v27  ;;  %v810_v54 = vsel %vm420_vm5, %v798_v27, %v802_v46  ;;  %v2989_v26 = vld [vmem:[%s2285_s18] sm:$0xff] }
 0x221   : > { %1094 = vmatpush1.msra.mxu0 %v845_v2  ;;  %1164 = vmatprep.subr.mxu1 %v839_v29  ;;  %v2998_v29 = vld [vmem:[%s2285_s18 + $0x10] sm:$0xff] }
 0x222   : > { %1165 = vmatpush1.msra.mxu1 %v841_v37  ;;  %1589 = vrot.lane.b32.xlu1 %v2291_v1, %s2204_s19 }
 0x223   : > { %1095 = vmatprep.subr.mxu0 %v812_v34  ;;  %1309 = vrot.lane.b32.xlu0 %v2547_v36, %s2210_s25  ;;  %v806_v52 = vpop.permute.xlu1 %805 }
 0x224   : > { %v770_v53 = vpop.permute.xlu0 %769  ;;  %v814_v38 = vsel %vm420_vm5, %v806_v52, %v794_v22  ;;  %v808_v39 = vsel %vm420_vm5, %v802_v46, %v806_v52 }
 0x225   : > { %1096 = vmatpush1.msra.mxu0 %v814_v38  ;;  %1166 = vmatprep.subr.mxu1 %v808_v39 }
 0x226   : > { %1601 = vrot.lane.b32.xlu1 %v2288_v0, %s2204_s19  ;;  %1097 = vmatprep.subr.mxu0 %v811_v50 }
 0x227   : > { %1249 = vrot.lane.b32.xlu0 %v2535_v33, %s2213_s26  ;;  %1167 = vmatpush1.msra.mxu1 %v810_v54  ;;  %v766_v40 = vpop.permute.xlu1 %765 }
 0x228   : > { %1098 = vmatpush1.msra.mxu0 %v813_v47  ;;  %1168 = vmatprep.subr.mxu1 %v807_v51  ;;  %v730_v11 = vpop.permute.xlu0 %729  ;;  %v780_v12 = vsel %vm403_vm6, %v762_v30, %v766_v40  ;;  %v778_v14 = vsel %vm403_vm6, %v766_v40, %v770_v53 }
 0x229   : > { %1169 = vmatpush1.msra.mxu1 %v809_v41  ;;  %1099 = vmatprep.subr.mxu0 %v780_v12 }
 0x22a   : > { %1543 = vrot.lane.b32.xlu1 %v2520_v28, %s2205_s20 }
 0x22b   : > { %1261 = vrot.lane.b32.xlu0 %v2547_v36, %s2213_s26  ;;  %v774_v56 = vpop.permute.xlu1 %773 }
 0x22c   : > { %v738_v57 = vpop.permute.xlu0 %737  ;;  %v782_v13 = vsel %vm403_vm6, %v774_v56, %v762_v30  ;;  %v776_v55 = vsel %vm403_vm6, %v770_v53, %v774_v56 }
 0x22d   : > { %1100 = vmatpush1.msra.mxu0 %v782_v13  ;;  %1170 = vmatprep.subr.mxu1 %v776_v55 }
 0x22e   : > { %1555 = vrot.lane.b32.xlu1 %v2523_v31, %s2205_s20  ;;  %1101 = vmatprep.subr.mxu0 %v779_v58 }
 0x22f   : > { %1597 = vrot.lane.b32.xlu0 %v2535_v33, %s2204_s19  ;;  %1171 = vmatpush1.msra.mxu1 %v778_v14  ;;  %v734_v15 = vpop.permute.xlu1 %733 }
 0x230   : > { %1102 = vmatpush1.msra.mxu0 %v781_v42  ;;  %1172 = vmatprep.subr.mxu1 %v775_v43  ;;  %v962_v16 = vpop.permute.xlu0 %961  ;;  %v748_v17 = vsel %vm386_vm7, %v730_v11, %v734_v15 }
 0x231   : > { %1173 = vmatpush1.msra.mxu1 %v777_v44  ;;  %1103 = vmatprep.subr.mxu0 %v748_v17 }
 0x232   : > { %1541 = vrot.lane.b32.xlu1 %v2291_v1, %s2205_s20  ;;  %v746_v1 = vsel %vm386_vm7, %v734_v15, %v738_v57 }
 0x233   : > { %1609 = vrot.lane.b32.xlu0 %v2547_v36, %s2204_s19  ;;  %v742_v60 = vpop.permute.xlu1 %741 }
 0x234   : > { %v970_v61 = vpop.permute.xlu0 %969  ;;  %v750_v18 = vsel %vm386_vm7, %v742_v60, %v730_v11  ;;  %v744_v59 = vsel %vm386_vm7, %v738_v57, %v742_v60 }
 0x235   : > { %1104 = vmatpush1.msra.mxu0 %v750_v18  ;;  %1174 = vmatprep.subr.mxu1 %v744_v59 }
 0x236   : > { %1553 = vrot.lane.b32.xlu1 %v2288_v0, %s2205_s20  ;;  %1105 = vmatprep.subr.mxu0 %v747_v62  ;;  %v745_v0 = vsel %vm386_vm7, %v2691_v63, %v2705_v7  ;;  %v991_v63 = vld [vmem:[%s3561_s4] sm:$0xff]  ;;  %v979_v7 = vsel %vm509_vm0, %v2715_v10, %v2711_v9 }
 0x237   : > { %1549 = vrot.lane.b32.xlu0 %v2535_v33, %s2205_s20  ;;  %1175 = vmatpush1.msra.mxu1 %v746_v1  ;;  %v966_v45 = vpop.permute.xlu1 %965 }
 0x238   : > { %1106 = vmatpush1.msra.mxu0 %v749_v19  ;;  %1176 = vmatprep.subr.mxu1 %v743_v21  ;;  %v968_v22 = vpop.permute.xlu0 %967  ;;  %v978_v23 = vsel %vm509_vm0, %v966_v45, %v970_v61  ;;  %v980_v3 = vsel %vm509_vm0, %v962_v16, %v966_v45 }
 0x239   : > { %1177 = vmatpush1.msra.mxu1 %v745_v0  ;;  %1135 = vmatprep.subr.mxu0 %v978_v23  ;;  %v977_v5 = vsel %vm509_vm0, %v2711_v9, %v968_v22 }
 0x23a   : > { %1495 = vrot.lane.b32.xlu1 %v2520_v28, %s2206_s21  ;;  %1136 = vmatpush2.msra.mxu0 %v980_v3 }
 0x23b   : > { %1561 = vrot.lane.b32.xlu0 %v2547_v36, %s2205_s20  ;;  %v974_v6 = vpop.permute.xlu1 %973  ;;  %1137 = vmatprep.subr.mxu0 %v977_v5 }
 0x23c   : > { %1138 = vmatpush2.msra.mxu0 %v979_v7  ;;  %v982_v46 = vsel %vm509_vm0, %v974_v6, %v962_v16  ;;  %v976_v48 = vsel %vm509_vm0, %v970_v61, %v974_v6 }
 0x23d   : > { %1140 = vmatmul.mubr.f32.vlgmr.msra.gmra.mxu0 %v991_v63  ;;  %1206 = vmatprep.subr.mxu1 %v982_v46 }
 0x23e   : > { %1507 = vrot.lane.b32.xlu1 %v2523_v31, %s2206_s21  ;;  %1207 = vmatpush2.msra.mxu1 %v976_v48 }
 0x23f   : > { %1501 = vrot.lane.b32.xlu0 %v2535_v33, %s2206_s21  ;;  %v972_v49 = vpop.permute.xlu1 %971 }
 0x240   : > { %v981_v9 = vsel %vm509_vm0, %v972_v49, %v2715_v10  ;;  %v975_v25 = vsel %vm509_vm0, %v968_v22, %v972_v49 }
 0x241   : > { %1208 = vmatprep.subr.mxu1 %v981_v9 }
 0x242   : > { %1493 = vrot.lane.b32.xlu1 %v2989_v26, %s2206_s21  ;;  %1209 = vmatpush2.msra.mxu1 %v975_v25 }
 0x243   : > { %1513 = vrot.lane.b32.xlu0 %v2547_v36, %s2206_s21  ;;  %v1446_v27 = vpop.permute.xlu1 %1445  ;;  %1211 = vmatmul.mubr.f32.vlgmr.msra.gmra.mxu1 %v991_v63 }
 0x245   : > { %v2995_v2 = vpop.permute.xlu0 %1068 }
 0x246   : > { %1505 = vrot.lane.b32.xlu1 %v2998_v29, %s2206_s21 }
 0x247   : > { %1453 = vrot.lane.b32.xlu0 %v2535_v33, %s2207_s22  ;;  %v1458_v10 = vpop.permute.xlu1 %1457 }
 0x249   : > { %v1452_v30 = vpop.permute.xlu0 %1451 }
 0x24a   : > { %1447 = vrot.lane.b32.xlu1 %v2520_v28, %s2207_s22  ;;  %v1475_v45 = vsel %vm458_vm3, %v1446_v27, %v1452_v30  ;;  %v1472_v0 = vsel %vm458_vm3, %v1452_v30, %v1458_v10 }
 0x24b   : > { %v1388_v34 = vpop.permute.xlu1 %1387  ;;  %1757 = vmatprep.subr.mxu0 %v1472_v0 }
 0x24c   : > { %1758 = vmatpush1.msra.mxu0 %v1475_v45 }
 0x24d   : > { %v1464_v37 = vpop.permute.xlu0 %1463 }
 0x24e   : > { %v1469_v21 = vsel %vm458_vm3, %v1458_v10, %v1464_v37  ;;  %v1478_v23 = vsel %vm458_vm3, %v1464_v37, %v1446_v27 }
 0x24f   : > { %v1400_v52 = vpop.permute.xlu1 %1399  ;;  %1828 = vmatprep.subr.mxu1 %v1478_v23 }
 0x250   : > { %1829 = vmatpush1.msra.mxu1 %v1469_v21 }
 0x251   : > { %v1392_v53 = vpop.permute.xlu0 %1391 }
 0x253   : > { %v1386_v38 = vpop.permute.xlu1 %1385 }
 0x254   : > { %v3063_v48 = vsel %vm437_vm4, %v1386_v38, %v1392_v53 }
 0x255   : > { %v1404_v39 = vpop.permute.xlu0 %1403 }
 0x256   : > { %v3008_v50 = vsel %vm437_vm4, %v1404_v39, %v1386_v38 }
 0x257   : > { %v1398_v54 = vpop.permute.xlu1 %1397 }
 0x258   : > { %v3012_v40 = vsel %vm437_vm4, %v1392_v53, %v1398_v54  ;;  %v3075_v10 = vsel %vm437_vm4, %v1398_v54, %v1404_v39 }
 0x259   : > { %v1344_v47 = vpop.permute.xlu0 %1343 }
 0x25b   : > { %v1340_v51 = vpop.permute.xlu1 %1339 }
 0x25d   : > { %v1356_v41 = vpop.permute.xlu0 %1355 }
 0x25f   : > { %v1352_v11 = vpop.permute.xlu1 %1351 }
 0x261   : > { %v1296_v12 = vpop.permute.xlu0 %1295 }
 0x263   : > { %v1338_v56 = vpop.permute.xlu1 %1337 }
 0x264   : > { %v3016_v57 = vsel %vm420_vm5, %v1356_v41, %v1338_v56  ;;  %v3087_v45 = vsel %vm420_vm5, %v1338_v56, %v1344_v47 }
 0x265   : > { %v1308_v13 = vpop.permute.xlu0 %1307 }
 0x267   : > { %v1350_v55 = vpop.permute.xlu1 %1349 }
 0x268   : > { %v3020_v58 = vsel %vm420_vm5, %v1344_v47, %v1350_v55  ;;  %v3104_v0 = vsel %vm420_vm5, %v1350_v55, %v1356_v41 }
 0x269   : > { %v1248_v14 = vpop.permute.xlu0 %1247 }
 0x26b   : > { %v1292_v15 = vpop.permute.xlu1 %1291 }
 0x26d   : > { %v3022_v42 = vpop.permute.xlu0 %1259 }
 0x26f   : > { %v1304_v43 = vpop.permute.xlu1 %1303 }
 0x271   : > { %v3024_v44 = vpop.permute.xlu0 %1595 }
 0x273   : > { %v1290_v16 = vpop.permute.xlu1 %1289 }
 0x274   : > { %v3028_v17 = vsel %vm403_vm6, %v1308_v13, %v1290_v16 }
 0x275   : > { %v3030_v60 = vpop.permute.xlu0 %1607 }
 0x277   : > { %v1302_v61 = vpop.permute.xlu1 %1301 }
 0x278   : > { %v3034_v18 = vsel %vm403_vm6, %v1296_v12, %v1302_v61 }
 0x279   : > { %v3036_v59 = vpop.permute.xlu0 %1547 }
 0x27b   : > { %v1244_v62 = vpop.permute.xlu1 %1243 }
 0x27d   : > { %v3038_v1 = vpop.permute.xlu0 %1559 }
 0x27f   : > { %v1256_v19 = vpop.permute.xlu1 %1255 }
 0x281   : > { %v3046_v22 = vpop.permute.xlu0 %1499 }
 0x283   : > { %v1242_v3 = vpop.permute.xlu1 %1241 }
 0x284   : > { %v3053_v5 = vsel %vm386_vm7, %v3022_v42, %v1242_v3 }
 0x285   : > { %v3055_v63 = vpop.permute.xlu0 %1511 }
 0x287   : > { %v1254_v6 = vpop.permute.xlu1 %1253 }
 0x288   : > { %v3059_v7 = vsel %vm386_vm7, %v1248_v14, %v1254_v6 }
 0x289   : > { %3570 = vst [vmem:[#allocation4_spill] sm:$0xff] %v3059_v7  ;;  %v1394_v46 = vpop.permute.xlu0 %1393 }
 0x28a   : > { %v3067_v49 = vsel %vm437_vm4, %v1394_v46, %v1400_v52  ;;  %v3071_v9 = vsel %vm437_vm4, %v1388_v34, %v1394_v46 }
 0x28c   : > { %v1592_v25 = vpop.permute.xlu1 %1591 }
 0x28d   : > { %v1406_v27 = vpop.permute.xlu0 %1405 }
 0x28e   : > { %v3079_v30 = vsel %vm437_vm4, %v1406_v27, %v1388_v34  ;;  %v3083_v37 = vsel %vm437_vm4, %v1400_v52, %v1406_v27 }
 0x290   : > { %v1604_v53 = vpop.permute.xlu1 %1603 }
 0x291   : > { %v1346_v38 = vpop.permute.xlu0 %1345 }
 0x292   : > { %v3091_v21 = vsel %vm420_vm5, %v1346_v38, %v1352_v11  ;;  %v3095_v39 = vsel %vm420_vm5, %v1340_v51, %v1346_v38  ;;  %v3121_v38 = vsel %vm403_vm6, %v1290_v16, %v1296_v12 }
 0x294   : > { %v1590_v34 = vpop.permute.xlu1 %1589 }
 0x295   : > { %v3100_v52 = vsel %vm509_vm0, %v1590_v34, %v3024_v44  ;;  %v1358_v54 = vpop.permute.xlu0 %1357 }
 0x296   : > { %3571 = vst [vmem:[#allocation5_spill] sm:$0xff] %v3100_v52  ;;  %v3108_v47 = vsel %vm420_vm5, %v1358_v54, %v1340_v51  ;;  %v3112_v56 = vsel %vm420_vm5, %v1352_v11, %v1358_v54  ;;  %v3133_v54 = vsel %vm403_vm6, %v1302_v61, %v1308_v13 }
 0x298   : > { %v1602_v23 = vpop.permute.xlu1 %1601 }
 0x299   : > { %v3117_v46 = vsel %vm509_vm0, %v1602_v23, %v3030_v60  ;;  %v1298_v27 = vpop.permute.xlu0 %1297 }
 0x29a   : > { %3572 = vst [vmem:[#allocation6_spill] sm:$0xff] %v3117_v46  ;;  %v3125_v41 = vsel %vm403_vm6, %v1298_v27, %v1304_v43  ;;  %v3129_v51 = vsel %vm403_vm6, %v1292_v15, %v1298_v27  ;;  %v3145_v27 = vsel %vm386_vm7, %v1242_v3, %v1248_v14  ;;  %v3163_v14 = vsel %vm386_vm7, %v1254_v6, %v3022_v42 }
 0x29b   : > { %3574 = vst [vmem:[#allocation8_spill] sm:$0xff] %v3163_v14  ;;  %v3181_v42 = vsel %vm509_vm0, %v3024_v44, %v1602_v23 }
 0x29c   : > { %v1544_v11 = vpop.permute.xlu1 %1543  ;;  %3576 = vst [vmem:[#allocation10_spill] sm:$0xff] %v3181_v42 }
 0x29d   : > { %v1310_v55 = vpop.permute.xlu0 %1309 }
 0x29e   : > { %v3137_v4 = vsel %vm403_vm6, %v1310_v55, %v1292_v15  ;;  %v3141_v12 = vsel %vm403_vm6, %v1304_v43, %v1310_v55 }
 0x2a0   : > { %v1556_v16 = vpop.permute.xlu1 %1555 }
 0x2a1   : > { %v1250_v46 = vpop.permute.xlu0 %1249 }
 0x2a2   : > { %v3149_v52 = vsel %vm386_vm7, %v1250_v46, %v1256_v19  ;;  %v3153_v13 = vsel %vm386_vm7, %v1244_v62, %v1250_v46 }
 0x2a4   : > { %v1542_v15 = vpop.permute.xlu1 %1541 }
 0x2a5   : > { %v3158_v43 = vsel %vm492_vm1, %v1542_v15, %v3036_v59  ;;  %v1262_v61 = vpop.permute.xlu0 %1261 }
 0x2a6   : > { %3573 = vst [vmem:[#allocation7_spill] sm:$0xff] %v3158_v43  ;;  %v3167_v3 = vsel %vm386_vm7, %v1262_v61, %v1244_v62  ;;  %v3171_v46 = vsel %vm386_vm7, %v1256_v19, %v1262_v61 }
 0x2a8   : > { %v1554_v55 = vpop.permute.xlu1 %1553 }
 0x2a9   : > { %v3176_v7 = vsel %vm492_vm1, %v1554_v55, %v3038_v1  ;;  %v1598_v43 = vpop.permute.xlu0 %1597 }
 0x2aa   : > { %3575 = vst [vmem:[#allocation9_spill] sm:$0xff] %v3176_v7  ;;  %v3185_v62 = vsel %vm509_vm0, %v1592_v25, %v1598_v43  ;;  %v3189_v19 = vsel %vm509_vm0, %v1598_v43, %v1604_v53  ;;  %v3194_v7 = vsel %vm509_vm0, %v3030_v60, %v1590_v34  ;;  %v3207_v43 = vsel %vm492_vm1, %v3036_v59, %v1554_v55 }
 0x2ab   : > { %3577 = vst [vmem:[#allocation11_spill] sm:$0xff] %v3185_v62  ;;  %3578 = vst [vmem:[#allocation12_spill] sm:$0xff] %v3207_v43  ;;  %v3225_v59 = vsel %vm492_vm1, %v3038_v1, %v1542_v15 }
 0x2ac   : > { %v1496_v6 = vpop.permute.xlu1 %1495  ;;  %3580 = vst [vmem:[#allocation14_spill] sm:$0xff] %v3225_v59 }
 0x2ad   : > { %v1610_v61 = vpop.permute.xlu0 %1609 }
 0x2ae   : > { %v3198_v14 = vsel %vm509_vm0, %v1604_v53, %v1610_v61  ;;  %v3202_v44 = vsel %vm509_vm0, %v1610_v61, %v1592_v25 }
 0x2b0   : > { %v1508_v23 = vpop.permute.xlu1 %1507 }
 0x2b1   : > { %v1550_v42 = vpop.permute.xlu0 %1549 }
 0x2b2   : > { %v3211_v62 = vsel %vm492_vm1, %v1544_v11, %v1550_v42  ;;  %v3215_v60 = vsel %vm492_vm1, %v1550_v42, %v1556_v16 }
 0x2b4   : > { %v1494_v53 = vpop.permute.xlu1 %1493 }
 0x2b5   : > { %v3220_v25 = vsel %vm475_vm2, %v1494_v53, %v3046_v22  ;;  %v1562_v34 = vpop.permute.xlu0 %1561 }
 0x2b6   : > { %3579 = vst [vmem:[#allocation13_spill] sm:$0xff] %v3220_v25  ;;  %v3229_v55 = vsel %vm492_vm1, %v1556_v16, %v1562_v34  ;;  %v3233_v42 = vsel %vm492_vm1, %v1562_v34, %v1544_v11  ;;  %v3256_v34 = vsel %vm475_vm2, %v3055_v63, %v1494_v53 }
 0x2b7   : > { %3585 = vst [vmem:[#allocation19_spill] sm:$0xff] %v3256_v34 }
 0x2b8   : > { %v1506_v61 = vpop.permute.xlu1 %1505 }
 0x2b9   : > { %v3238_v43 = vsel %vm475_vm2, %v1506_v61, %v3055_v63  ;;  %v1502_v25 = vpop.permute.xlu0 %1501  ;;  %v3243_v1 = vsel %vm475_vm2, %v3046_v22, %v1506_v61 }
 0x2ba   : > { %3581 = vst [vmem:[#allocation15_spill] sm:$0xff] %v3238_v43  ;;  %3582 = vst [vmem:[#allocation16_spill] sm:$0xff] %v3243_v1  ;;  %v3247_v16 = vsel %vm475_vm2, %v1496_v6, %v1502_v25  ;;  %v3251_v11 = vsel %vm475_vm2, %v1502_v25, %v1508_v23 }
 0x2bb   : > { %3583 = vst [vmem:[#allocation17_spill] sm:$0xff] %v3247_v16  ;;  %3584 = vst [vmem:[#allocation18_spill] sm:$0xff] %v3251_v11 }
 0x2bd   : > { %v1514_v15 = vpop.permute.xlu0 %1513 }
 0x2be   : > { %v3260_v43 = vsel %vm475_vm2, %v1508_v23, %v1514_v15  ;;  %v3264_v22 = vsel %vm475_vm2, %v1514_v15, %v1496_v6 }
 0x2fd   : > { %v1141_v61 = vpop.f32.mrf.mxu0 }
 0x2fe   : > { %v1142_v1 = vadd.f32 %v1141_v61, %v2995_v2  ;;  %v3377_v61 = vpop.permute.xlu1 %1447 }
 0x2ff   : > { %v1143_v16 = vpop.f32.mrf.mxu0 }
 0x300   : > { %v1217_v25 = vmax.f32 %v1142_v1, 0.0  ;;  %v1144_v11 = vadd.f32 %v1143_v16, %v2995_v2 }
 0x302   : > { %v3269_v59 = vmul.f32 %v1217_v25, %v2512_v20  ;;  %v1218_v63 = vmax.f32 %v1144_v11, 0.0  ;;  %v1747_v11 = vld [vmem:[%s3564_s7] sm:$0xff]  ;;  %v3379_v25 = vpop.permute.xlu0 %1453 }
 0x303   : > { %v1212_v53 = vpop.f32.mrf.mxu1 }
 0x304   : > { %v3272_v23 = vmul.f32 %v1218_v63, %v2528_v32  ;;  %v1213_v34 = vadd.f32 %v1212_v53, %v2995_v2  ;;  %1389 = vrot.lane.b32.xlu1 %v3269_v59, %s2208_s23 }
 0x305   : > { %v1214_v6 = vpop.f32.mrf.mxu1 }
 0x306   : > { %v1219_v15 = vmax.f32 %v1213_v34, 0.0  ;;  %v1215_v1 = vadd.f32 %v1214_v6, %v2995_v2  ;;  %1395 = vrot.lane.b32.xlu0 %v3272_v23, %s2208_s23  ;;  %1759 = vmatprep.subr.mxu0 %v3272_v23  ;;  %v3293_v2 = vld [vmem:[%s2285_s18 + $0x8] sm:$0xff]  ;;  %v1928_v34 = vld [vmem:[%s3566_s9] sm:$0xff] }
 0x307   : > { %1760 = vmatpush1.msra.mxu0 %v3269_v59 }
 0x308   : > { %v3283_v20 = vmul.f32 %v1219_v15, %v2517_v24  ;;  %v1220_v32 = vmax.f32 %v1215_v1, 0.0  ;;  %1761 = vmatprep.subr.mxu0 %v2535_v33  ;;  %v3308_v24 = vld [vmem:[%s2285_s18 + $0x18] sm:$0xff] }
 0x309   : > { %1762 = vmatpush1.msra.mxu0 %v2520_v28 }
 0x30a   : > { %v3288_v16 = vmul.f32 %v1220_v32, %v2540_v35  ;;  %1401 = vrot.lane.b32.xlu1 %v3283_v20, %s2208_s23  ;;  %1763 = vmatprep.subr.mxu0 %v3293_v2  ;;  %v1638_v35 = vld [vmem:[%s3563_s6 + $0x8] sm:$0xff] }
 0x30b   : > { %1764 = vmatpush1.msra.mxu0 %v2989_v26  ;;  %2160 = vmatprep.mubr.msk.f32.mxu0 %vm1753_vm10, %v1638_v35 }
 0x30c   : > { %1407 = vrot.lane.b32.xlu0 %v3288_v16, %s2208_s23  ;;  %1830 = vmatprep.subr.mxu1 %v3288_v16  ;;  %s359_s23 = scalar_lea.vmem %s3567_s10, %s2166_s15 }
 0x30d   : > { %1831 = vmatpush1.msra.mxu1 %v3283_v20  ;;  %2161 = vmatprep.mubr.msk.f32.mxu1 %vm1753_vm10, %v1638_v35 }
 0x30e   : > { %1341 = vrot.lane.b32.xlu1 %v3269_v59, %s2209_s24  ;;  %1832 = vmatprep.subr.mxu1 %v2547_v36 }
 0x30f   : > { %1833 = vmatpush1.msra.mxu1 %v2523_v31 }
 0x310   : > { %1347 = vrot.lane.b32.xlu0 %v3272_v23, %s2209_s24  ;;  %1834 = vmatprep.subr.mxu1 %v3308_v24 }
 0x311   : > { %1835 = vmatpush1.msra.mxu1 %v2998_v29 }
 0x312   : > { %1353 = vrot.lane.b32.xlu1 %v3283_v20, %s2209_s24 }
 0x314   : > { %1359 = vrot.lane.b32.xlu0 %v3288_v16, %s2209_s24 }
 0x316   : > { %1293 = vrot.lane.b32.xlu1 %v3269_v59, %s2210_s25 }
 0x318   : > { %1299 = vrot.lane.b32.xlu0 %v3272_v23, %s2210_s25 }
 0x31a   : > { %1305 = vrot.lane.b32.xlu1 %v3283_v20, %s2210_s25 }
 0x31c   : > { %1311 = vrot.lane.b32.xlu0 %v3288_v16, %s2210_s25 }
 0x31e   : > { %1245 = vrot.lane.b32.xlu1 %v3269_v59, %s2213_s26 }
 0x320   : > { %1251 = vrot.lane.b32.xlu0 %v3272_v23, %s2213_s26 }
 0x322   : > { %1257 = vrot.lane.b32.xlu1 %v3283_v20, %s2213_s26 }
 0x324   : > { %1263 = vrot.lane.b32.xlu0 %v3288_v16, %s2213_s26 }
 0x326   : > { %1593 = vrot.lane.b32.xlu1 %v3269_v59, %s2204_s19 }
 0x328   : > { %1599 = vrot.lane.b32.xlu0 %v3272_v23, %s2204_s19 }
 0x32a   : > { %1605 = vrot.lane.b32.xlu1 %v3283_v20, %s2204_s19 }
 0x32c   : > { %1611 = vrot.lane.b32.xlu0 %v3288_v16, %s2204_s19 }
 0x32e   : > { %1545 = vrot.lane.b32.xlu1 %v3269_v59, %s2205_s20 }
 0x330   : > { %1551 = vrot.lane.b32.xlu0 %v3272_v23, %s2205_s20 }
 0x332   : > { %1557 = vrot.lane.b32.xlu1 %v3283_v20, %s2205_s20 }
 0x334   : > { %1563 = vrot.lane.b32.xlu0 %v3288_v16, %s2205_s20 }
 0x336   : > { %1497 = vrot.lane.b32.xlu1 %v3269_v59, %s2206_s21 }
 0x338   : > { %1503 = vrot.lane.b32.xlu0 %v3272_v23, %s2206_s21 }
 0x33a   : > { %1509 = vrot.lane.b32.xlu1 %v3283_v20, %s2206_s21 }
 0x33c   : > { %1515 = vrot.lane.b32.xlu0 %v3288_v16, %s2206_s21 }
 0x33e   : > { %1449 = vrot.lane.b32.xlu1 %v3269_v59, %s2207_s22 }
 0x340   : > { %1455 = vrot.lane.b32.xlu0 %v3272_v23, %s2207_s22 }
 0x342   : > { %1461 = vrot.lane.b32.xlu1 %v3283_v20, %s2207_s22 }
 0x344   : > { %1467 = vrot.lane.b32.xlu0 %v3288_v16, %s2207_s22 }
 0x346   : > { %1459 = vrot.lane.b32.xlu1 %v2523_v31, %s2207_s22 }
 0x348   : > { %1465 = vrot.lane.b32.xlu0 %v2547_v36, %s2207_s22 }
 0x34a   : > { %1750 = vperm.xlu1 %2187, %v1747_v11  }
 0x34c   : > { %1931 = vperm.xlu0 %2186, %v1928_v34  }
 0x376   : > { %v1390_v63 = vpop.permute.xlu1 %1389 }
 0x378   : > { %v1396_v53 = vpop.permute.xlu0 %1395 }
 0x379   : > { %v1417_v6 = vsel %vm437_vm4, %v1390_v63, %v1396_v53 }
 0x37a   : > { %1765 = vmatprep.subr.mxu0 %v1417_v6 }
 0x37c   : > { %v1402_v15 = vpop.permute.xlu1 %1401 }
 0x37d   : > { %v1414_v11 = vsel %vm437_vm4, %v1396_v53, %v1402_v15  ;;  %v3587_v53 = vld [vmem:[#allocation4_spill] sm:$0xff] }
 0x37e   : > { %v1408_v1 = vpop.permute.xlu0 %1407 }
 0x37f   : > { %v1420_v32 = vsel %vm437_vm4, %v1408_v1, %v1390_v63  ;;  %v1411_v35 = vsel %vm437_vm4, %v1402_v15, %v1408_v1  ;;  %v3588_v15 = vld [vmem:[#allocation11_spill] sm:$0xff] }
 0x380   : > { %v1342_v34 = vpop.permute.xlu1 %1341  ;;  %1766 = vmatpush1.msra.mxu0 %v1420_v32  ;;  %1836 = vmatprep.subr.mxu1 %v1411_v35  ;;  %v3589_v32 = vld [vmem:[#allocation10_spill] sm:$0xff] }
 0x381   : > { %1767 = vmatprep.subr.mxu0 %v3071_v9  ;;  %1837 = vmatpush1.msra.mxu1 %v1414_v11  ;;  %v3590_v11 = vld [vmem:[#allocation5_spill] sm:$0xff] }
 0x382   : > { %1768 = vmatpush1.msra.mxu0 %v3079_v30  ;;  %1838 = vmatprep.subr.mxu1 %v3083_v37  ;;  %v1348_v6 = vpop.permute.xlu0 %1347 }
 0x383   : > { %1769 = vmatprep.subr.mxu0 %v3063_v48  ;;  %1839 = vmatpush1.msra.mxu1 %v3067_v49  ;;  %v1369_v63 = vsel %vm420_vm5, %v1342_v34, %v1348_v6 }
 0x384   : > { %v1354_v1 = vpop.permute.xlu1 %1353  ;;  %1770 = vmatpush1.msra.mxu0 %v3008_v50  ;;  %1840 = vmatprep.subr.mxu1 %v3075_v10 }
 0x385   : > { %1771 = vmatprep.subr.mxu0 %v1369_v63  ;;  %1841 = vmatpush1.msra.mxu1 %v3012_v40  ;;  %v1366_v49 = vsel %vm420_vm5, %v1348_v6, %v1354_v1  ;;  %v3591_v6 = vld [vmem:[#allocation6_spill] sm:$0xff] }
 0x386   : > { %v1360_v9 = vpop.permute.xlu0 %1359 }
 0x387   : > { %v1372_v30 = vsel %vm420_vm5, %v1360_v9, %v1342_v34  ;;  %v1363_v48 = vsel %vm420_vm5, %v1354_v1, %v1360_v9 }
 0x388   : > { %v1294_v37 = vpop.permute.xlu1 %1293  ;;  %1772 = vmatpush1.msra.mxu0 %v1372_v30  ;;  %1842 = vmatprep.subr.mxu1 %v1363_v48  ;;  %v3593_v48 = vld [vmem:[#allocation7_spill] sm:$0xff] }
 0x389   : > { %1773 = vmatprep.subr.mxu0 %v3095_v39  ;;  %1843 = vmatpush1.msra.mxu1 %v1366_v49 }
 0x38a   : > { %1774 = vmatpush1.msra.mxu0 %v3108_v47  ;;  %1844 = vmatprep.subr.mxu1 %v3112_v56  ;;  %v1300_v50 = vpop.permute.xlu0 %1299 }
 0x38b   : > { %1775 = vmatprep.subr.mxu0 %v3087_v45  ;;  %1845 = vmatpush1.msra.mxu1 %v3091_v21  ;;  %v1321_v40 = vsel %vm403_vm6, %v1294_v37, %v1300_v50 }
 0x38c   : > { %v1306_v10 = vpop.permute.xlu1 %1305  ;;  %1776 = vmatpush1.msra.mxu0 %v3016_v57  ;;  %1846 = vmatprep.subr.mxu1 %v3104_v0 }
 0x38d   : > { %1777 = vmatprep.subr.mxu0 %v1321_v40  ;;  %1847 = vmatpush1.msra.mxu1 %v3020_v58  ;;  %v1318_v21 = vsel %vm403_vm6, %v1300_v50, %v1306_v10  ;;  %v3595_v50 = vld [vmem:[#allocation9_spill] sm:$0xff] }
 0x38e   : > { %v1312_v39 = vpop.permute.xlu0 %1311 }
 0x38f   : > { %v1324_v47 = vsel %vm403_vm6, %v1312_v39, %v1294_v37  ;;  %v1315_v45 = vsel %vm403_vm6, %v1306_v10, %v1312_v39  ;;  %v3594_v37 = vld [vmem:[#allocation14_spill] sm:$0xff] }
 0x390   : > { %v1246_v56 = vpop.permute.xlu1 %1245  ;;  %1778 = vmatpush1.msra.mxu0 %v1324_v47  ;;  %1848 = vmatprep.subr.mxu1 %v1315_v45  ;;  %v3596_v39 = vld [vmem:[#allocation18_spill] sm:$0xff]  ;;  %v3597_v47 = vld [vmem:[#allocation17_spill] sm:$0xff]  ;;  %v3598_v45 = vld [vmem:[#allocation16_spill] sm:$0xff] }
 0x391   : > { %1779 = vmatprep.subr.mxu0 %v3129_v51  ;;  %1849 = vmatpush1.msra.mxu1 %v1318_v21 }
 0x392   : > { %1780 = vmatpush1.msra.mxu0 %v3137_v4  ;;  %1850 = vmatprep.subr.mxu1 %v3141_v12  ;;  %v1252_v57 = vpop.permute.xlu0 %1251 }
 0x393   : > { %1781 = vmatprep.subr.mxu0 %v3121_v38  ;;  %1851 = vmatpush1.msra.mxu1 %v3125_v41  ;;  %v1273_v58 = vsel %vm386_vm7, %v1246_v56, %v1252_v57 }
 0x394   : > { %v1258_v0 = vpop.permute.xlu1 %1257  ;;  %1782 = vmatpush1.msra.mxu0 %v3028_v17  ;;  %1852 = vmatprep.subr.mxu1 %v3133_v54  ;;  %v3586_v54 = vld [vmem:[#allocation8_spill] sm:$0xff] }
 0x395   : > { %1783 = vmatprep.subr.mxu0 %v1273_v58  ;;  %1853 = vmatpush1.msra.mxu1 %v3034_v18  ;;  %v1270_v41 = vsel %vm386_vm7, %v1252_v57, %v1258_v0  ;;  %v3600_v58 = vld [vmem:[#allocation19_spill] sm:$0xff] }
 0x396   : > { %v1264_v51 = vpop.permute.xlu0 %1263 }
 0x397   : > { %v1276_v4 = vsel %vm386_vm7, %v1264_v51, %v1246_v56  ;;  %v1267_v38 = vsel %vm386_vm7, %v1258_v0, %v1264_v51  ;;  %v3599_v56 = vld [vmem:[#allocation13_spill] sm:$0xff]  ;;  %v3601_v0 = vld [vmem:[#allocation15_spill] sm:$0xff] }
 0x398   : > { %v1594_v12 = vpop.permute.xlu1 %1593  ;;  %1784 = vmatpush1.msra.mxu0 %v1276_v4  ;;  %1854 = vmatprep.subr.mxu1 %v1267_v38 }
 0x399   : > { %1785 = vmatprep.subr.mxu0 %v3153_v13  ;;  %1855 = vmatpush1.msra.mxu1 %v1270_v41 }
 0x39a   : > { %1786 = vmatpush1.msra.mxu0 %v3167_v3  ;;  %1856 = vmatprep.subr.mxu1 %v3171_v46  ;;  %v1600_v17 = vpop.permute.xlu0 %1599 }
 0x39b   : > { %1787 = vmatprep.subr.mxu0 %v3145_v27  ;;  %1857 = vmatpush1.msra.mxu1 %v3149_v52  ;;  %v1621_v3 = vsel %vm509_vm0, %v1594_v12, %v1600_v17 }
 0x39c   : > { %v1606_v18 = vpop.permute.xlu1 %1605  ;;  %1788 = vmatpush1.msra.mxu0 %v3053_v5  ;;  %1858 = vmatprep.subr.mxu1 %v3586_v54 }
 0x39d   : > { %1859 = vmatpush1.msra.mxu1 %v3587_v53  ;;  %v1618_v13 = vsel %vm509_vm0, %v1600_v17, %v1606_v18  ;;  %v1637_v17 = vld [vmem:[%s3563_s6] sm:$0xff] }
 0x39e   : > { %1799 = vmatprep.subr.mxu0 %v1618_v13  ;;  %v1612_v46 = vpop.permute.xlu0 %1611 }
 0x39f   : > { %v1615_v27 = vsel %vm509_vm0, %v1606_v18, %v1612_v46  ;;  %1800 = vmatpush2.msra.mxu0 %v1621_v3  ;;  %v1624_v52 = vsel %vm509_vm0, %v1612_v46, %v1594_v12  ;;  %v1476_v18 = vsel %vm458_vm3, %v3377_v61, %v3379_v25  ;;  %v3602_v3 = vmov 0.0  }
 0x3a0   : > { %v1546_v5 = vpop.permute.xlu1 %1545  ;;  %1801 = vmatprep.subr.mxu0 %v3189_v19  ;;  %1870 = vmatprep.subr.mxu1 %v1624_v52 }
 0x3a1   : > { %1802 = vmatpush2.msra.mxu0 %v3588_v15  ;;  %1871 = vmatpush2.msra.mxu1 %v1615_v27 }
 0x3a2   : > { %1803 = vmatprep.subr.mxu0 %v3589_v32  ;;  %1872 = vmatprep.subr.mxu1 %v3202_v44  ;;  %v1552_v35 = vpop.permute.xlu0 %1551 }
 0x3a3   : > { %1804 = vmatpush2.msra.mxu0 %v3590_v11  ;;  %1873 = vmatpush2.msra.mxu1 %v3198_v14  ;;  %v1573_v63 = vsel %vm492_vm1, %v1546_v5, %v1552_v35 }
 0x3a4   : > { %v1558_v34 = vpop.permute.xlu1 %1557  ;;  %1874 = vmatprep.subr.mxu1 %v3194_v7  ;;  %v3592_v7 = vld [vmem:[#allocation12_spill] sm:$0xff] }
 0x3a5   : > { %1875 = vmatpush2.msra.mxu1 %v3591_v6  ;;  %v1570_v19 = vsel %vm492_vm1, %v1552_v35, %v1558_v34 }
 0x3a6   : > { %1805 = vmatprep.subr.mxu0 %v1570_v19  ;;  %v1564_v1 = vpop.permute.xlu0 %1563 }
 0x3a7   : > { %v1567_v44 = vsel %vm492_vm1, %v1558_v34, %v1564_v1  ;;  %1806 = vmatpush2.msra.mxu0 %v1573_v63  ;;  %v1576_v14 = vsel %vm492_vm1, %v1564_v1, %v1546_v5  ;;  %v2193_v63 = vld [vmem:[%s3558_s1 + $0x8] sm:$0xff] }
 0x3a8   : > { %v1498_v9 = vpop.permute.xlu1 %1497  ;;  %1807 = vmatprep.subr.mxu0 %v3215_v60  ;;  %1876 = vmatprep.subr.mxu1 %v1576_v14  ;;  %v2194_v14 = vld [vmem:[%s3558_s1 + $0x18] sm:$0xff] }
 0x3a9   : > { %1808 = vmatpush2.msra.mxu0 %v3211_v62  ;;  %1877 = vmatpush2.msra.mxu1 %v1567_v44 }
 0x3aa   : > { %1809 = vmatprep.subr.mxu0 %v3592_v7  ;;  %1878 = vmatprep.subr.mxu1 %v3233_v42  ;;  %v1504_v30 = vpop.permute.xlu0 %1503  ;;  %v2195_v7 = vld [vmem:[%s3558_s1 + $0x10] sm:$0xff] }
 0x3ab   : > { %1810 = vmatpush2.msra.mxu0 %v3593_v48  ;;  %1879 = vmatpush2.msra.mxu1 %v3229_v55  ;;  %v1525_v62 = vsel %vm475_vm2, %v1498_v9, %v1504_v30  ;;  %v1911_v48 = vld [vmem:[%s3565_s8] sm:$0xff] }
 0x3ac   : > { %v1510_v49 = vpop.permute.xlu1 %1509  ;;  %1880 = vmatprep.subr.mxu1 %v3594_v37 }
 0x3ad   : > { %1881 = vmatpush2.msra.mxu1 %v3595_v50  ;;  %v1522_v60 = vsel %vm475_vm2, %v1504_v30, %v1510_v49 }
 0x3ae   : > { %1811 = vmatprep.subr.mxu0 %v1522_v60  ;;  %v1516_v40 = vpop.permute.xlu0 %1515 }
 0x3af   : > { %v1519_v42 = vsel %vm475_vm2, %v1510_v49, %v1516_v40  ;;  %1812 = vmatpush2.msra.mxu0 %v1525_v62  ;;  %v1528_v55 = vsel %vm475_vm2, %v1516_v40, %v1498_v9 }
 0x3b0   : > { %v1450_v10 = vpop.permute.xlu1 %1449  ;;  %1813 = vmatprep.subr.mxu0 %v3596_v39  ;;  %1882 = vmatprep.subr.mxu1 %v1528_v55 }
 0x3b1   : > { %1814 = vmatpush2.msra.mxu0 %v3597_v47  ;;  %1883 = vmatpush2.msra.mxu1 %v1519_v42 }
 0x3b2   : > { %1815 = vmatprep.subr.mxu0 %v3598_v45  ;;  %1884 = vmatprep.subr.mxu1 %v3264_v22  ;;  %v1456_v21 = vpop.permute.xlu0 %1455 }
 0x3b3   : > { %1816 = vmatpush2.msra.mxu0 %v3599_v56  ;;  %1885 = vmatpush2.msra.mxu1 %v3260_v43  ;;  %v1477_v4 = vsel %vm458_vm3, %v1450_v10, %v1456_v21 }
 0x3b4   : > { %v1462_v57 = vpop.permute.xlu1 %1461  ;;  %1886 = vmatprep.subr.mxu1 %v3600_v58 }
 0x3b5   : > { %1887 = vmatpush2.msra.mxu1 %v3601_v0  ;;  %v1474_v51 = vsel %vm458_vm3, %v1456_v21, %v1462_v57 }
 0x3b6   : > { %1817 = vmatprep.subr.mxu0 %v1474_v51  ;;  %v1468_v38 = vpop.permute.xlu0 %1467 }
 0x3b7   : > { %v1471_v22 = vsel %vm458_vm3, %v1462_v57, %v1468_v38  ;;  %1818 = vmatpush2.msra.mxu0 %v1477_v4  ;;  %v1480_v43 = vsel %vm458_vm3, %v1468_v38, %v1450_v10 }
 0x3b8   : > { %v1460_v41 = vpop.permute.xlu1 %1459  ;;  %1888 = vmatprep.subr.mxu1 %v1480_v43 }
 0x3b9   : > { %1889 = vmatpush2.msra.mxu1 %v1471_v22  ;;  %v1473_v12 = vsel %vm458_vm3, %v3379_v25, %v1460_v41 }
 0x3ba   : > { %1819 = vmatprep.subr.mxu0 %v1473_v12  ;;  %v1466_v54 = vpop.permute.xlu0 %1465 }
 0x3bb   : > { %v1470_v53 = vsel %vm458_vm3, %v1460_v41, %v1466_v54  ;;  %1820 = vmatpush2.msra.mxu0 %v1476_v18  ;;  %v1479_v13 = vsel %vm458_vm3, %v1466_v54, %v3377_v61  ;;  %v2192_v61 = vld [vmem:[%s3558_s1] sm:$0xff] }
 0x3bc   : > { %1822 = vmatmul.mubr.f32.vlgmr.msra.gmra.mxu0 %v1637_v17  ;;  %1890 = vmatprep.subr.mxu1 %v1479_v13 }
 0x3bd   : > { %1891 = vmatpush2.msra.mxu1 %v1470_v53  ;;  %2002 = vmatprep.mubr.f32.mxu0 %v3602_v3 }
 0x3be   : > { %1893 = vmatmul.mubr.f32.vlgmr.msra.gmra.mxu1 %v1637_v17 }
 0x3bf   : > { %2073 = vmatprep.mubr.f32.mxu1 %v3602_v3 }
 0x3c5   : > { %v1751_v46 = vpop.permute.xlu1 %1750 }
 0x47c   : > { %v1823_v25 = vpop.f32.mrf.mxu0 }
 0x47d   : > { %v1824_v27 = vadd.f32 %v1823_v25, %v1751_v46 }
 0x47e   : > { %v1825_v52 = vpop.f32.mrf.mxu0  ;;  %v1894_v5 = vpop.f32.mrf.mxu1 }
 0x47f   : > { %v1899_v15 = vmax.f32 %v1824_v27, 0.0  ;;  %v1826_v32 = vadd.f32 %v1825_v52, %v1751_v46  ;;  %v1895_v35 = vadd.f32 %v1894_v5, %v1751_v46 }
 0x480   : > { %v1896_v11 = vpop.f32.mrf.mxu1 }
 0x481   : > { %v1900_v34 = vmax.f32 %v1826_v32, 0.0  ;;  %v1897_v8 = vadd.f32 %v1896_v11, %v1751_v46  ;;  %v1903_v6 = vmul.f32 %v2192_v61, %v1899_v15  ;;  %v1901_v19 = vmax.f32 %v1895_v35, 0.0 }
 0x483   : > { %v1904_v1 = vmul.f32 %v2193_v63, %v1900_v34  ;;  %v1902_v44 = vmax.f32 %v1897_v8, 0.0  ;;  %v1905_v30 = vmul.f32 %v2195_v7, %v1901_v19 }
 0x485   : > { %v1906_v9 = vmul.f32 %v2194_v14, %v1902_v44  ;;  %1962 = vmatprep.subr.mxu0 %v1904_v1 }
 0x486   : > { %1963 = vmatpush1.msra.mxu0 %v1903_v6 }
 0x487   : > { %1964 = vmatprep.subr.mxu0 %v3272_v23  ;;  %2033 = vmatprep.subr.mxu1 %v1906_v9 }
 0x488   : > { %1965 = vmatpush1.msra.mxu0 %v3269_v59  ;;  %2034 = vmatpush1.msra.mxu1 %v1905_v30 }
 0x489   : > { %1966 = vmatprep.subr.mxu0 %v2535_v33  ;;  %2035 = vmatprep.subr.mxu1 %v3288_v16 }
 0x48a   : > { %1967 = vmatpush1.msra.mxu0 %v2520_v28  ;;  %2036 = vmatpush1.msra.mxu1 %v3283_v20  ;;  %v1932_v28 = vpop.permute.xlu0 %1931 }
 0x48b   : > { %1968 = vmatprep.subr.mxu0 %v3293_v2  ;;  %2037 = vmatprep.subr.mxu1 %v2547_v36 }
 0x48c   : > { %1969 = vmatpush1.msra.mxu0 %v2989_v26  ;;  %2038 = vmatpush1.msra.mxu1 %v2523_v31 }
 0x48d   : > { %2162 = vmatmul.mubr.msk.f32.vlgmr.msra.gmra.mxu0 %vm1934_vm11, %v1911_v48  ;;  %2039 = vmatprep.subr.mxu1 %v3308_v24 }
 0x48e   : > { %2040 = vmatpush1.msra.mxu1 %v2998_v29 }
 0x48f   : > { %2163 = vmatmul.mubr.msk.f32.vlgmr.msra.gmra.mxu1 %vm1934_vm11, %v1911_v48 }
 0x54d   : > { %v2004_v33 = vpop.f32.mrf.mxu0 }
 0x54e   : > { %v2005_v59 = vadd.f32 %v2004_v33, %v1932_v28 }
 0x54f   : > { %v2006_v23 = vpop.f32.mrf.mxu0  ;;  %v2075_v36 = vpop.f32.mrf.mxu1 }
 0x550   : > { %v2084_v20 = vadd.f32 %v2989_v26, %v2005_v59  ;;  %v2007_v16 = vadd.f32 %v2006_v23, %v1932_v28  ;;  %v2076_v31 = vadd.f32 %v2075_v36, %v1932_v28 }
 0x551   : > { %v2077_v49 = vpop.f32.mrf.mxu1 }
 0x552   : > { %2088 = vst [vmem:[%s359_s23] sm:$0xff] %v2084_v20  ;;  %v2085_v37 = vadd.f32 %v3293_v2, %v2007_v16  ;;  %v2086_v50 = vadd.f32 %v2998_v29, %v2076_v31  ;;  %v2078_v60 = vadd.f32 %v2077_v49, %v1932_v28 }
 0x554   : > { %2089 = vst [vmem:[%s359_s23 + $0x8] sm:$0xff] %v2085_v37  ;;  %2090 = vst [vmem:[%s359_s23 + $0x10] sm:$0xff] %v2086_v50  ;;  %v2087_v62 = vadd.f32 %v3308_v24, %v2078_v60 }
 0x556   : > { %2091 = vst [vmem:[%s359_s23 + $0x18] sm:$0xff] %v2087_v62 }
 0x557 PF: > { %s20_s13 = sadd.s32 1, %s2202_s13  }
 0x558   : > { %p17_p4 = scmp.ge.s32.totalorder %s20_s13, 4  }
 0x55a   :  { %19 = sbr.rel (!%p17_p4) target bundleno = 1 (0x1), region = 90 }

</bundles_post_ra>
